<compile_context>
chip_gen: v6e
topology: v6e:2x2x1
jax: 0.10.0
libtpu: 0.0.40
codegen_flags: <defaults>
</compile_context>

<pallas_src>
import functools

import jax
import jax.numpy as jnp
from jax.experimental import pallas as pl
from jax.experimental.pallas import tpu as pltpu


def _round_up(n, m):
    return ((n + m - 1) // m) * m


def _vmem_capacity_bytes():
    try:
        return int(pltpu.get_tpu_info().vmem_capacity_bytes)
    except Exception:
        return 64 * 1024 * 1024  # conservative fallback (v7x-sized VMEM)


def _layernorm_kernel(x_ref, gamma_ref, beta_ref, o_ref, *, epsilon, inv_d):
    """Plain path: one logical row per physical row (lane width = D)."""
    x = x_ref[...].astype(jnp.float32)                       # [R, D]
    mean = jnp.sum(x, axis=-1, keepdims=True) * inv_d        # [R, 1]
    xc = x - mean
    var = jnp.sum(xc * xc, axis=-1, keepdims=True) * inv_d   # [R, 1]
    r = pl.reciprocal(var + epsilon, approx=False)
    inv = r * r                                              # == 1/(var+eps)^2 (module's bug)
    out = xc * inv
    out = out * gamma_ref[...].astype(jnp.float32)
    out = out + beta_ref[...].astype(jnp.float32)
    o_ref[...] = out.astype(o_ref.dtype)


def _layernorm_packed_kernel(x_ref, gamma_ref, beta_ref, s_ref, st_ref, o_ref,
                             *, epsilon, inv_d, p):
    """Lane-dense path: P = 128 // D logical rows packed along the lane axis.

    s_ref  : [128, 128] f32 segment-sum matrix, S[l, s] = 1 iff l // D == s
    st_ref : [128, 128] f32, S.T (segment -> lane broadcast)
    Per-segment reductions / broadcasts run as tiny matmuls on the idle MXU.
    """
    x = x_ref[...].astype(jnp.float32)                       # [R, 128]
    s_mat = s_ref[...]
    st_mat = st_ref[...]
    dot = functools.partial(jnp.dot,
                            preferred_element_type=jnp.float32,
                            precision=jax.lax.Precision.HIGHEST)

    seg_sum = dot(x, s_mat)                                  # [R, 128]; lanes < P valid
    mean = seg_sum * inv_d
    mean_b = dot(mean, st_mat)                               # broadcast back over segment lanes
    xc = x - mean_b

    seg_ss = dot(xc * xc, s_mat)
    var = seg_ss * inv_d
    # lanes >= P carry var == 0; park them at 1.0 so the reciprocal stays sane
    lane = jax.lax.broadcasted_iota(jnp.int32, var.shape, 1)
    var = jnp.where(lane < p, var, 1.0)

    r = pl.reciprocal(var + epsilon, approx=False)
    inv = r * r                                              # == 1/(var+eps)^2 (module's bug)
    inv_b = dot(inv, st_mat)

    out = xc * inv_b
    out = out * gamma_ref[...].astype(jnp.float32)
    out = out + beta_ref[...].astype(jnp.float32)
    o_ref[...] = out.astype(o_ref.dtype)


def layer_norm(x, gamma, beta, *, epsilon=1e-12, tile_rows=None,
               target_block_bytes=None):
    """x: [..., D]; gamma, beta: [D]. Returns same shape/dtype as x."""
    orig_shape = x.shape
    D = orig_shape[-1]
    x2 = x.reshape(-1, D)
    N = x2.shape[0]

    # ---------------- generation-aware VMEM budget ----------------
    vmem_cap = _vmem_capacity_bytes()
    big_vmem = vmem_cap >= 100 * 1024 * 1024          # v5e / v6e (128 MiB parts)
    if target_block_bytes is None:
        target_block_bytes = (4 << 20) if big_vmem else (2 << 20)   # v7x: stay small
    vmem_limit = (64 << 20) if big_vmem else (32 << 20)

    # ---------------- choose layout (lane-dense repack for small D) ----------------
    pack = (D < 128) and (128 % D == 0) and (N % (128 // D) == 0)
    if pack:
        P = 128 // D
        n_rows = N // P
        width = 128
        x_in = x2.reshape(n_rows, width)              # contiguous -> free reshape
        gamma_in = jnp.tile(gamma.reshape(1, D), (1, P))            # [1, 128]
        beta_in = jnp.tile(beta.reshape(1, D), (1, P))              # [1, 128]
        lane_ids = jnp.arange(width)
        s_mat = ((lane_ids[:, None] // D) == lane_ids[None, :]).astype(jnp.float32)
        st_mat = s_mat.T
    else:
        P = 1
        n_rows = N
        width = D
        x_in = x2
        gamma_in = gamma.reshape(1, D)
        beta_in = beta.reshape(1, D)
        s_mat = st_mat = None

    # ---------------- tile sizing ----------------
    sublane = 16 if x.dtype in (jnp.bfloat16, jnp.float16) else 8
    if tile_rows is None:
        rows_budget = max(sublane,
                          (target_block_bytes // (width * 4)) // sublane * sublane)
        # Keep >= 2 grid steps whenever possible: feeds both v7x TensorCores and
        # keeps the BlockSpec double-buffer pipeline busy.
        half = _round_up(pl.cdiv(n_rows, 2), sublane)
        tile_rows = max(sublane, min(rows_budget, half))
    else:
        tile_rows = max(sublane, _round_up(tile_rows, sublane))
    # Never exceed the array extent (a block equal to the full dim is always legal).
    tile_rows = min(tile_rows, n_rows)
    num_tiles = pl.cdiv(n_rows, tile_rows)   # ragged tail masked by Pallas, no pad/copy

    row_spec = pl.BlockSpec((tile_rows, width), lambda i: (i, 0))
    vec_spec = pl.BlockSpec((1, width), lambda i: (0, 0))

    if pack:
        kernel = functools.partial(_layernorm_packed_kernel,
                                   epsilon=float(epsilon),
                                   inv_d=1.0 / float(D), p=P)
        in_specs = [row_spec, vec_spec, vec_spec,
                    pl.BlockSpec((width, width), lambda i: (0, 0)),
                    pl.BlockSpec((width, width), lambda i: (0, 0))]
        args = (x_in, gamma_in, beta_in, s_mat, st_mat)
    else:
        kernel = functools.partial(_layernorm_kernel,
                                   epsilon=float(epsilon),
                                   inv_d=1.0 / float(D))
        in_specs = [row_spec, vec_spec, vec_spec]
        args = (x_in, gamma_in, beta_in)

    out = pl.pallas_call(
        kernel,
        out_shape=jax.ShapeDtypeStruct((n_rows, width), x.dtype),
        grid_spec=pltpu.PrefetchScalarGridSpec(
            num_scalar_prefetch=0,
            grid=(num_tiles,),
            in_specs=in_specs,
            out_specs=pl.BlockSpec((tile_rows, width), lambda i: (i, 0)),
        ),
        compiler_params=pltpu.CompilerParams(
            dimension_semantics=("parallel",),
            vmem_limit_bytes=vmem_limit,
        ),
    )(*args)

    return out.reshape(orig_shape)


def _reference(x, gamma, beta, epsilon=1e-12):
    mean = jnp.mean(x, axis=-1, keepdims=True)
    xc = x - mean
    var = jnp.mean(xc * xc, axis=-1, keepdims=True)
    return xc / ((var + epsilon) ** 2) * gamma + beta


if __name__ == "__main__":
    key = jax.random.PRNGKey(0)
    batch, seq, hidden = 2, 8, 32          # input_dim = 32
    x_a = jax.random.normal(key, (batch, seq, hidden), dtype=jnp.float32)

    # deterministic parameter init, matching the module's __init__:
    gamma = jnp.ones((hidden,), dtype=jnp.float32)   # self.gamma = ones
    beta = jnp.zeros((hidden,), dtype=jnp.float32)   # self.beta  = zeros

    # 1) lane-dense packed path (D=32 -> 4 rows per 128-lane vector row)
    out_a = layer_norm(x_a, gamma, beta, epsilon=1e-12)
    jax.block_until_ready(out_a)
    assert jnp.allclose(out_a, _reference(x_a, gamma, beta), rtol=1e-5, atol=1e-5)

    # 2) packed path, multi-step grid + ragged packed tail (100 rows -> 25 packed rows)
    x_b = jax.random.normal(jax.random.PRNGKey(1), (4, 25, hidden), dtype=jnp.float32)
    out_b = layer_norm(x_b, gamma, beta, epsilon=1e-12, tile_rows=16)
    jax.block_until_ready(out_b)
    assert jnp.allclose(out_b, _reference(x_b, gamma, beta), rtol=1e-5, atol=1e-5)

    # 3) fallback plain path (111 rows, not divisible by 4) + ragged last block
    x_c = jax.random.normal(jax.random.PRNGKey(2), (3, 37, hidden), dtype=jnp.float32)
    out_c = layer_norm(x_c, gamma, beta, epsilon=1e-12, tile_rows=16)
    jax.block_until_ready(out_c)
    assert jnp.allclose(out_c, _reference(x_c, gamma, beta), rtol=1e-5, atol=1e-5)

    print("KERNEL_OK")
</pallas_src>

<mosaic_0001>
module attributes {stable_mosaic.version = 11 : i64} {
  func.func @_layernorm_packed_kernel(%arg0: i32, %arg1: memref<4x128xf32, #tpu.memory_space<vmem>>, %arg2: memref<1x128xf32, #tpu.memory_space<vmem>>, %arg3: memref<1x128xf32, #tpu.memory_space<vmem>>, %arg4: memref<128x128xf32, #tpu.memory_space<vmem>>, %arg5: memref<128x128xf32, #tpu.memory_space<vmem>>, %arg6: memref<4x128xf32, #tpu.memory_space<vmem>>) attributes {dimension_semantics = [#tpu.dimension_semantics<parallel>], iteration_bounds = array<i64: 1>, scalar_prefetch = 0 : i64, scratch_operands = 0 : i64, tpu.core_type = #tpu.core_type<tc>, window_params = [{transform_indices = @transform_0, window_bounds = array<i64: 4, 128>}, {pipeline_mode = #tpu.pipeline_mode<synchronous>, transform_indices = @transform_1, window_bounds = array<i64: 1, 128>}, {pipeline_mode = #tpu.pipeline_mode<synchronous>, transform_indices = @transform_2, window_bounds = array<i64: 1, 128>}, {pipeline_mode = #tpu.pipeline_mode<synchronous>, transform_indices = @transform_3, window_bounds = array<i64: 128, 128>}, {pipeline_mode = #tpu.pipeline_mode<synchronous>, transform_indices = @transform_4, window_bounds = array<i64: 128, 128>}, {transform_indices = @transform_5, window_bounds = array<i64: 4, 128>}]} {
    %c0 = arith.constant 0 : index
    %c0_0 = arith.constant 0 : index
    %0 = vector.load %arg1[%c0, %c0_0] : memref<4x128xf32, #tpu.memory_space<vmem>>, vector<4x128xf32>
    %c0_1 = arith.constant 0 : index
    %c0_2 = arith.constant 0 : index
    %1 = vector.load %arg4[%c0_1, %c0_2] : memref<128x128xf32, #tpu.memory_space<vmem>>, vector<128x128xf32>
    %c0_3 = arith.constant 0 : index
    %c0_4 = arith.constant 0 : index
    %2 = vector.load %arg5[%c0_3, %c0_4] : memref<128x128xf32, #tpu.memory_space<vmem>>, vector<128x128xf32>
    %cst = arith.constant dense<0.000000e+00> : vector<4x128xf32>
    %3 = tpu.matmul %0, %1, %cst {dimension_numbers = #tpu.dot_dimension_numbers<[1], [0], [0], [1], [0, 0, 1, 1], [], []>, precision = #tpu.contract_precision<fp32>} : vector<4x128xf32>, vector<128x128xf32>, vector<4x128xf32> -> vector<4x128xf32>
    %cst_5 = arith.constant 3.125000e-02 : f32
    %4 = vector.broadcast %cst_5 : f32 to vector<4x128xf32>
    %5 = arith.mulf %3, %4 : vector<4x128xf32>
    %cst_6 = arith.constant dense<0.000000e+00> : vector<4x128xf32>
    %6 = tpu.matmul %5, %2, %cst_6 {dimension_numbers = #tpu.dot_dimension_numbers<[1], [0], [0], [1], [0, 0, 1, 1], [], []>, precision = #tpu.contract_precision<fp32>} : vector<4x128xf32>, vector<128x128xf32>, vector<4x128xf32> -> vector<4x128xf32>
    %7 = arith.subf %0, %6 : vector<4x128xf32>
    %8 = arith.mulf %7, %7 : vector<4x128xf32>
    %cst_7 = arith.constant dense<0.000000e+00> : vector<4x128xf32>
    %9 = tpu.matmul %8, %1, %cst_7 {dimension_numbers = #tpu.dot_dimension_numbers<[1], [0], [0], [1], [0, 0, 1, 1], [], []>, precision = #tpu.contract_precision<fp32>} : vector<4x128xf32>, vector<128x128xf32>, vector<4x128xf32> -> vector<4x128xf32>
    %cst_8 = arith.constant 3.125000e-02 : f32
    %10 = vector.broadcast %cst_8 : f32 to vector<4x128xf32>
    %11 = arith.mulf %9, %10 : vector<4x128xf32>
    %12 = tpu.iota {dimensions = array<i32: 1>} : vector<4x128xi32>
    %c4_i32 = arith.constant 4 : i32
    %13 = vector.broadcast %c4_i32 : i32 to vector<4x128xi32>
    %14 = arith.cmpi slt, %12, %13 : vector<4x128xi32>
    %cst_9 = arith.constant 1.000000e+00 : f32
    %15 = vector.broadcast %cst_9 : f32 to vector<4x128xf32>
    %16 = arith.select %14, %11, %15 : vector<4x128xi1>, vector<4x128xf32>
    %cst_10 = arith.constant 9.99999996E-13 : f32
    %17 = vector.broadcast %cst_10 : f32 to vector<4x128xf32>
    %18 = arith.addf %16, %17 : vector<4x128xf32>
    %19 = tpu.reciprocal %18 : vector<4x128xf32> -> vector<4x128xf32>
    %20 = arith.mulf %19, %19 : vector<4x128xf32>
    %cst_11 = arith.constant dense<0.000000e+00> : vector<4x128xf32>
    %21 = tpu.matmul %20, %2, %cst_11 {dimension_numbers = #tpu.dot_dimension_numbers<[1], [0], [0], [1], [0, 0, 1, 1], [], []>, precision = #tpu.contract_precision<fp32>} : vector<4x128xf32>, vector<128x128xf32>, vector<4x128xf32> -> vector<4x128xf32>
    %22 = arith.mulf %7, %21 : vector<4x128xf32>
    %c0_12 = arith.constant 0 : index
    %c0_13 = arith.constant 0 : index
    %23 = vector.load %arg2[%c0_12, %c0_13] : memref<1x128xf32, #tpu.memory_space<vmem>>, vector<1x128xf32>
    %24 = vector.broadcast %23 : vector<1x128xf32> to vector<4x128xf32>
    %25 = arith.mulf %22, %24 : vector<4x128xf32>
    %c0_14 = arith.constant 0 : index
    %c0_15 = arith.constant 0 : index
    %26 = vector.load %arg3[%c0_14, %c0_15] : memref<1x128xf32, #tpu.memory_space<vmem>>, vector<1x128xf32>
    %27 = vector.broadcast %26 : vector<1x128xf32> to vector<4x128xf32>
    %28 = arith.addf %25, %27 : vector<4x128xf32>
    %c0_16 = arith.constant 0 : index
    %c0_17 = arith.constant 0 : index
    %29 = vector.load %arg6[%c0_16, %c0_17] : memref<4x128xf32, #tpu.memory_space<vmem>>, vector<4x128xf32>
    tpu.vector_store %arg6[%c0_16, %c0_17], %28 {strides = array<i32>} : memref<4x128xf32, #tpu.memory_space<vmem>>, vector<4x128xf32>,
    return
  }
  func.func @transform_0(%arg0: i32) -> (i32, i32) {
    %c0_i32 = arith.constant 0 : i32
    %c0_i32_0 = arith.constant 0 : i32
    return %arg0, %c0_i32 : i32, i32
  }
  func.func @transform_1(%arg0: i32) -> (i32, i32) {
    %c0_i32 = arith.constant 0 : i32
    %c0_i32_0 = arith.constant 0 : i32
    %c0_i32_1 = arith.constant 0 : i32
    return %c0_i32, %c0_i32_0 : i32, i32
  }
  func.func @transform_2(%arg0: i32) -> (i32, i32) {
    %c0_i32 = arith.constant 0 : i32
    %c0_i32_0 = arith.constant 0 : i32
    %c0_i32_1 = arith.constant 0 : i32
    return %c0_i32, %c0_i32_0 : i32, i32
  }
  func.func @transform_3(%arg0: i32) -> (i32, i32) {
    %c0_i32 = arith.constant 0 : i32
    %c0_i32_0 = arith.constant 0 : i32
    %c0_i32_1 = arith.constant 0 : i32
    return %c0_i32, %c0_i32_0 : i32, i32
  }
  func.func @transform_4(%arg0: i32) -> (i32, i32) {
    %c0_i32 = arith.constant 0 : i32
    %c0_i32_0 = arith.constant 0 : i32
    %c0_i32_1 = arith.constant 0 : i32
    return %c0_i32, %c0_i32_0 : i32, i32
  }
  func.func @transform_5(%arg0: i32) -> (i32, i32) {
    %c0_i32 = arith.constant 0 : i32
    %c0_i32_0 = arith.constant 0 : i32
    return %arg0, %c0_i32 : i32, i32
  }
}

</mosaic_0001>

<bundles_post_ra>
// kernel: tpu_custom_call.1
= control target key start
LH: loop header
LB: loop body
LE: loop exit
PB: predicated region body
PF: predicated region fallthrough
CT: control target
= control target key end

     0   :  { %10 = vsyncpa [#allocation3], 0  ;;  %s5358_s0 = inlined_call_operand.hbm [shape: f32[4,128], index: 0, kind: input, shape index: {}]   ;;  %s5359_s1 = inlined_call_operand.vmem [shape: f32[1,128], index: 1, kind: input, shape index: {}]   ;;  %s5360_s2 = inlined_call_operand.vmem [shape: f32[1,128], index: 2, kind: input, shape index: {}]   ;;  %s5361_s3 = inlined_call_operand.hbm [shape: f32[128,128], index: 3, kind: input, shape index: {}]   ;;  %s5362_s4 = inlined_call_operand.hbm [shape: f32[128,128], index: 4, kind: input, shape index: {}]   ;;  %s5363_s5 = inlined_call_operand.hbm [shape: f32[4,128], index: 5, kind: output, shape index: {}]  }
   0x1   :  { %11 = vsyncpa [#allocation6], 0 }
   0x2   :  { %12 = vsyncpa [#allocation4], 0  ;;  %s4049_s18 = smov [#allocation5]  }
   0x3   :  { %s32_s19 = sshll.u32 %s4049_s18, 4  ;;  %s33_s19 = int_to_ptr.vmem [resolvable:$true] %s32_s19 }
   0x4   :  { %s3971_s20 = scalar_lea.vmem %s33_s19, 2048  ;;  %p3976_p1 = scmp.lt.s32.totalorder %s33_s19, %s33_s19 }
   0x5   :  { %p3972_p0 = scmp.ne.s32.totalorder %s33_s19, %s3971_s20  ;;  %p3977_p2 = scmp.lt.s32.totalorder %s3971_s20, %s3971_s20 }
   0x7   :  { %p3978_p3 = por %p3977_p2, %p3976_p1 }
   0x9   :  { %p3979_p4 = pnand %p3978_p3, %p3972_p0 }
   0xb   :  { %3982 = shalt.err (!%p3979_p4)
}
   0xc   :  { %s4050_s21 = smov 128   ;;  %s4051_s22 = smov 8  }
   0xd   :  { %38 = dma.hbm_to_vmem [thread:$0]  %s5361_s3, 2048, %s33_s19, [#allocation6], %s4050_s21, %s4050_s21, %s4051_s22  }
   0xe   :  { %s4052_s25 = smov [#allocation2]   ;;  %s4053_s27 = smov [#allocation7]  }
   0xf   :  { %s19_s26 = sshll.u32 %s4052_s25, 4  ;;  %s44_s28 = sshll.u32 %s4053_s27, 4  ;;  %s20_s26 = int_to_ptr.vmem [resolvable:$true] %s19_s26  ;;  %s45_s28 = int_to_ptr.vmem [resolvable:$true] %s44_s28 }
  0x10   :  { %s3991_s29 = scalar_lea.vmem %s20_s26, 64  ;;  %p3996_p6 = scmp.lt.s32.totalorder %s20_s26, %s20_s26 }
  0x11   :  { %p3992_p5 = scmp.ne.s32.totalorder %s20_s26, %s3991_s29  ;;  %p3997_p7 = scmp.lt.s32.totalorder %s3991_s29, %s3991_s29 }
  0x13   :  { %p3998_p8 = por %p3997_p7, %p3996_p6 }
  0x15   :  { %p3999_p9 = pnand %p3998_p8, %p3992_p5 }
  0x17   :  { %4002 = shalt.err (!%p3999_p9)
}
  0x18   :  { %22 = dma.hbm_to_vmem [thread:$0]  %s5358_s0, 64, %s20_s26, [#allocation3]  }
  0x19   :  { %s4011_s7 = scalar_lea.vmem %s45_s28, 2048  ;;  %p4016_p11 = scmp.lt.s32.totalorder %s45_s28, %s45_s28 }
  0x1a   :  { %p4012_p10 = scmp.ne.s32.totalorder %s45_s28, %s4011_s7  ;;  %p4017_p12 = scmp.lt.s32.totalorder %s4011_s7, %s4011_s7 }
  0x1c   :  { %p4018_p13 = por %p4017_p12, %p4016_p11 }
  0x1e   :  { %p4019_p0 = pnand %p4018_p13, %p4012_p10 }
  0x20   :  { %4022 = shalt.err (!%p4019_p0)
}
  0x21   :  { %50 = dma.hbm_to_vmem [thread:$0]  %s5362_s4, 2048, %s45_s28, [#allocation6], %s4050_s21, %s4050_s21, %s4051_s22  }
  0x22   :  { %4043 = dma.done.wait [#allocation3], 64  }
  0x23   :  { %4044 = vsyncadd [#allocation3], 4294967232 }
  0x24   :  { %4045 = dma.done.wait [#allocation6], 4096  }
  0x25   :  { %4046 = vsyncadd [#allocation6], 4294963200  ;;  %v5386_v0 = vmov 0.0   ;;  %vm4055_vm0 = vmmov 0   ;;  %v76_v1 = vld [vmem:[#allocation5 + $0x78] sm:$0xff]  ;;  %v75_v2 = vld [vmem:[#allocation5 + $0x70] sm:$0xff] }
  0x26   :  { %3112 = vmatprep.subr.mxu0 %v5386_v0  ;;  %3147 = vmatprep.subr.mxu1 %v5386_v0  ;;  %v74_v3 = vld [vmem:[#allocation5 + $0x68] sm:$0xff]  ;;  %v4102_v4 = vand.u32 4294901760, %v76_v1  ;;  %v4104_v5 = vand.u32 4294901760, %v75_v2  ;;  %v73_v7 = vld [vmem:[#allocation5 + $0x60] sm:$0xff]  ;;  %v72_v8 = vld [vmem:[#allocation5 + $0x58] sm:$0xff]  ;;  %s4056_s11 = smov [#allocation8]  }
  0x27   :  { %3144 = vmatprep.mubr.msk.f32.mxu0 %vm4055_vm0, %v5386_v0  ;;  %3179 = vmatprep.mubr.msk.f32.mxu1 %vm4055_vm0, %v5386_v0  ;;  %v4106_v6 = vand.u32 4294901760, %v74_v3  ;;  %v71_v9 = vld [vmem:[#allocation5 + $0x50] sm:$0xff]  ;;  %v4108_v10 = vand.u32 4294901760, %v73_v7  ;;  %v4110_v11 = vand.u32 4294901760, %v72_v8  ;;  %v70_v13 = vld [vmem:[#allocation5 + $0x48] sm:$0xff]  ;;  %v69_v14 = vld [vmem:[#allocation5 + $0x40] sm:$0xff] }
  0x28   :  { %5486 = vst [vmem:[#allocation12_spill] sm:$0xff] %v4102_v4  ;;  %5487 = vst [vmem:[#allocation13_spill] sm:$0xff] %v4104_v5  ;;  %v4112_v12 = vand.u32 4294901760, %v71_v9  ;;  %3113 = vmatpush3.msra.mxu0 %v4102_v4  ;;  %v4116_v15 = vsub.f32 %v76_v1, %v4102_v4  ;;  %v4119_v16 = vsub.f32 %v75_v2, %v4104_v5  ;;  %v4121_v17 = vand.u32 4294901760, %v70_v13  ;;  %v68_v19 = vld [vmem:[#allocation5 + $0x38] sm:$0xff]  ;;  %v67_v26 = vld [vmem:[#allocation5 + $0x30] sm:$0xff] }
  0x29   :  { %5488 = vst [vmem:[#allocation14_spill] sm:$0xff] %v4106_v6  ;;  %5489 = vst [vmem:[#allocation15_spill] sm:$0xff] %v4108_v10  ;;  %v4124_v18 = vsub.f32 %v74_v3, %v4106_v6  ;;  %3114 = vmatprep.subr.mxu0 %v5386_v0  ;;  %v4128_v20 = vsub.f32 %v73_v7, %v4108_v10  ;;  %v4131_v21 = vsub.f32 %v72_v8, %v4110_v11  ;;  %v66_v36 = vld [vmem:[#allocation5 + $0x28] sm:$0xff]  ;;  %v65_v41 = vld [vmem:[#allocation5 + $0x20] sm:$0xff]  ;;  %s2692_s12 = sshll.u32 %s4056_s11, 4  ;;  %s2693_s12 = int_to_ptr.vmem [resolvable:$true] %s2692_s12 }
  0x2a   :  { %5490 = vst [vmem:[#allocation16_spill] sm:$0xff] %v4110_v11  ;;  %5491 = vst [vmem:[#allocation17_spill] sm:$0xff] %v4112_v12  ;;  %3115 = vmatpush3.msra.mxu0 %v4104_v5  ;;  %v4135_v22 = vand.u32 4294901760, %v4116_v15  ;;  %v4138_v23 = vand.u32 4294901760, %v4119_v16  ;;  %v4143_v25 = vand.u32 4294901760, %v69_v14  ;;  %v4149_v28 = vand.u32 4294901760, %v68_v19  ;;  %p4028_p2 = scmp.lt.s32.totalorder %s2693_s12, %s2693_s12 }
  0x2b   :  { %5492 = vst [vmem:[#allocation18_spill] sm:$0xff] %v4116_v15  ;;  %5493 = vst [vmem:[#allocation19_spill] sm:$0xff] %v4119_v16  ;;  %v4141_v24 = vand.u32 4294901760, %v4124_v18  ;;  %3116 = vmatprep.subr.mxu0 %v5386_v0  ;;  %v4147_v27 = vand.u32 4294901760, %v4128_v20  ;;  %v4152_v29 = vand.u32 4294901760, %v4131_v21  ;;  %v4155_v30 = vsub.f32 %v71_v9, %v4112_v12  ;;  %v64_v49 = vld [vmem:[#allocation5 + $0x18] sm:$0xff] }
  0x2c   :  { %5494 = vst [vmem:[#allocation20_spill] sm:$0xff] %v4121_v17  ;;  %5495 = vst [vmem:[#allocation21_spill] sm:$0xff] %v4124_v18  ;;  %3117 = vmatpush3.msra.mxu0 %v4106_v6  ;;  %v188_v31 = vsub.f32 %v4116_v15, %v4135_v22  ;;  %v195_v32 = vsub.f32 %v4119_v16, %v4138_v23  ;;  %v4165_v34 = vsub.f32 %v70_v13, %v4121_v17  ;;  %v60_v50 = vld [vmem:[#allocation2] sm:$0xf]  ;;  %v63_v54 = vld [vmem:[#allocation5 + $0x10] sm:$0xff]  ;;  %s4023_s13 = scalar_lea.vmem %s2693_s12, 64 }
  0x2d   :  { %5496 = vst [vmem:[#allocation22_spill] sm:$0xff] %v4128_v20  ;;  %5497 = vst [vmem:[#allocation23_spill] sm:$0xff] %v4131_v21  ;;  %v202_v33 = vsub.f32 %v4124_v18, %v4141_v24  ;;  %3118 = vmatprep.subr.mxu0 %v5386_v0  ;;  %v4168_v35 = vand.u32 4294901760, %v67_v26  ;;  %v209_v39 = vsub.f32 %v4128_v20, %v4147_v27  ;;  %v4178_v40 = vand.u32 4294901760, %v4155_v30  ;;  %v62_v60 = vld [vmem:[#allocation5 + $0x8] sm:$0xff]  ;;  %v61_v7 = vld [vmem:[#allocation5] sm:$0xff]  ;;  %p4024_p1 = scmp.ne.s32.totalorder %s2693_s12, %s4023_s13  ;;  %p4029_p3 = scmp.lt.s32.totalorder %s4023_s13, %s4023_s13 }
  0x2e   :  { %5498 = vst [vmem:[#allocation24_spill] sm:$0xff] %v4135_v22  ;;  %5499 = vst [vmem:[#allocation25_spill] sm:$0xff] %v4138_v23  ;;  %3119 = vmatpush3.msra.mxu0 %v4108_v10  ;;  %v4171_v37 = vand.u32 4294901760, %v188_v31  ;;  %v4173_v38 = vand.u32 4294901760, %v195_v32  ;;  %v216_v42 = vsub.f32 %v4131_v21, %v4152_v29  ;;  %v4184_v43 = vsub.f32 %v69_v14, %v4143_v25 }
  0x2f   :  { %5500 = vst [vmem:[#allocation26_spill] sm:$0xff] %v4141_v24  ;;  %5501 = vst [vmem:[#allocation27_spill] sm:$0xff] %v4143_v25  ;;  %3120 = vmatprep.subr.mxu0 %v5386_v0  ;;  %v4188_v44 = vand.u32 4294901760, %v202_v33  ;;  %v4190_v45 = vand.u32 4294901760, %v66_v36  ;;  %v4193_v46 = vand.u32 4294901760, %v4165_v34  ;;  %v4196_v47 = vsub.f32 %v68_v19, %v4149_v28  ;;  %p4030_p4 = por %p4029_p3, %p4028_p2 }
  0x30   :  { %5502 = vst [vmem:[#allocation28_spill] sm:$0xff] %v4147_v27  ;;  %5503 = vst [vmem:[#allocation29_spill] sm:$0xff] %v4149_v28  ;;  %3121 = vmatpush3.msra.mxu0 %v4110_v11  ;;  %3148 = vmatpush3.msra.mxu1 %v4171_v37  ;;  %v4200_v48 = vand.u32 4294901760, %v65_v41  ;;  %v4204_v51 = vand.u32 4294901760, %v209_v39  ;;  %v223_v52 = vsub.f32 %v4155_v30, %v4178_v40  ;;  %v4209_v53 = vand.u32 4294901760, %v4184_v43 }
  0x31   :  { %5504 = vst [vmem:[#allocation30_spill] sm:$0xff] %v4152_v29  ;;  %5505 = vst [vmem:[#allocation31_spill] sm:$0xff] %v4155_v30  ;;  %3122 = vmatprep.subr.mxu0 %v5386_v0  ;;  %3149 = vmatprep.subr.mxu1 %v5386_v0  ;;  %v4212_v55 = vsub.f32 %v67_v26, %v4168_v35  ;;  %v4216_v56 = vand.u32 4294901760, %v216_v42  ;;  %v4219_v57 = vand.u32 4294901760, %v4196_v47  ;;  %v4225_v59 = vand.u32 4294901760, %v64_v49  ;;  %p4031_p5 = pnand %p4030_p4, %p4024_p1 }
  0x32   :  { %5506 = vst [vmem:[#allocation32_spill] sm:$0xff] %v4165_v34  ;;  %5507 = vst [vmem:[#allocation33_spill] sm:$0xff] %v4168_v35  ;;  %3123 = vmatpush3.msra.mxu0 %v4112_v12  ;;  %3150 = vmatpush3.msra.mxu1 %v4173_v38  ;;  %v230_v58 = vsub.f32 %v4165_v34, %v4193_v46  ;;  %v4228_v61 = vsub.f32 %v66_v36, %v4190_v45  ;;  %v4230_v62 = vand.u32 4294901760, %v60_v50 }
  0x33   :  { %5508 = vst [vmem:[#allocation34_spill] sm:$0xff] %v4171_v37  ;;  %5509 = vst [vmem:[#allocation35_spill] sm:$0xff] %v4173_v38  ;;  %3124 = vmatprep.subr.mxu0 %v5386_v0  ;;  %3151 = vmatprep.subr.mxu1 %v5386_v0  ;;  %v4234_v63 = vand.u32 4294901760, %v63_v54  ;;  %v4238_v1 = vand.u32 4294901760, %v223_v52  ;;  %v237_v2 = vsub.f32 %v4184_v43, %v4209_v53  ;;  %v4243_v3 = vand.u32 4294901760, %v4212_v55 }
  0x34   :  { %5510 = vst [vmem:[#allocation36_spill] sm:$0xff] %v4178_v40  ;;  %5511 = vst [vmem:[#allocation37_spill] sm:$0xff] %v4184_v43  ;;  %3125 = vmatpush3.msra.mxu0 %v4121_v17  ;;  %3152 = vmatpush3.msra.mxu1 %v4188_v44  ;;  %v4246_v8 = vsub.f32 %v65_v41, %v4200_v48  ;;  %v244_v9 = vsub.f32 %v4196_v47, %v4219_v57  ;;  %v4252_v13 = vand.u32 4294901760, %v62_v60 }
  0x35   :  { %5512 = vst [vmem:[#allocation38_spill] sm:$0xff] %v4188_v44  ;;  %5513 = vst [vmem:[#allocation39_spill] sm:$0xff] %v4190_v45  ;;  %3126 = vmatprep.subr.mxu0 %v5386_v0  ;;  %3153 = vmatprep.subr.mxu1 %v5386_v0  ;;  %v4256_v14 = vand.u32 4294901760, %v230_v58  ;;  %v4259_v19 = vand.u32 4294901760, %v4228_v61  ;;  %v4262_v26 = vsub.f32 %v60_v50, %v4230_v62  ;;  %v4269_v32 = vand.u32 4294901760, %v61_v7 }
  0x36   :  { %5514 = vst [vmem:[#allocation40_spill] sm:$0xff] %v4193_v46  ;;  %5515 = vst [vmem:[#allocation41_spill] sm:$0xff] %v4196_v47  ;;  %3127 = vmatpush3.msra.mxu0 %v4143_v25  ;;  %3154 = vmatpush3.msra.mxu1 %v4204_v51  ;;  %v4265_v31 = vsub.f32 %v64_v49, %v4225_v59  ;;  %v4273_v33 = vand.u32 4294901760, %v237_v2  ;;  %v251_v36 = vsub.f32 %v4212_v55, %v4243_v3 }
  0x37   :  { %5516 = vst [vmem:[#allocation42_spill] sm:$0xff] %v4200_v48  ;;  %5517 = vst [vmem:[#allocation43_spill] sm:$0xff] %v4204_v51  ;;  %3128 = vmatprep.subr.mxu0 %v5386_v0  ;;  %3155 = vmatprep.subr.mxu1 %v5386_v0  ;;  %v4278_v39 = vand.u32 4294901760, %v4246_v8  ;;  %v4281_v41 = vsub.f32 %v63_v54, %v4234_v63  ;;  %v4285_v42 = vand.u32 4294901760, %v244_v9 }
  0x38   :  { %5518 = vst [vmem:[#allocation44_spill] sm:$0xff] %v4209_v53  ;;  %5519 = vst [vmem:[#allocation45_spill] sm:$0xff] %v4212_v55  ;;  %3129 = vmatpush3.msra.mxu0 %v4149_v28  ;;  %3156 = vmatpush3.msra.mxu1 %v4216_v56  ;;  %v258_v49 = vsub.f32 %v4228_v61, %v4259_v19  ;;  %v4293_v52 = vand.u32 4294901760, %v4265_v31  ;;  %v4296_v54 = vsub.f32 %v62_v60, %v4252_v13 }
  0x39   :  { %5520 = vst [vmem:[#allocation46_spill] sm:$0xff] %v4216_v56  ;;  %5521 = vst [vmem:[#allocation47_spill] sm:$0xff] %v4219_v57  ;;  %3130 = vmatprep.subr.mxu0 %v5386_v0  ;;  %3157 = vmatprep.subr.mxu1 %v5386_v0  ;;  %v4302_v58 = vand.u32 4294901760, %v251_v36  ;;  %v265_v2 = vsub.f32 %v4246_v8, %v4278_v39  ;;  %v4307_v9 = vand.u32 4294901760, %v4281_v41  ;;  %v5543_v36 = vand.u32 4294901760, %v4262_v26 }
  0x3a   :  { %5522 = vst [vmem:[#allocation48_spill] sm:$0xff] %v4225_v59  ;;  %5523 = vst [vmem:[#allocation49_spill] sm:$0xff] %v4228_v61  ;;  %3131 = vmatpush3.msra.mxu0 %v4168_v35  ;;  %3158 = vmatpush3.msra.mxu1 %v4238_v1  ;;  %v4310_v50 = vsub.f32 %v61_v7, %v4269_v32  ;;  %v4316_v60 = vand.u32 4294901760, %v258_v49  ;;  %v4324_v7 = vand.u32 4294901760, %v4296_v54 }
  0x3b   :  { %5524 = vst [vmem:[#allocation50_spill] sm:$0xff] %v4234_v63  ;;  %5525 = vst [vmem:[#allocation51_spill] sm:$0xff] %v4238_v1  ;;  %3132 = vmatprep.subr.mxu0 %v5386_v0  ;;  %3159 = vmatprep.subr.mxu1 %v5386_v0  ;;  %v4330_v49 = vand.u32 4294901760, %v265_v2 }
  0x3c   :  { %5526 = vst [vmem:[#allocation52_spill] sm:$0xff] %v4243_v3  ;;  %5527 = vst [vmem:[#allocation53_spill] sm:$0xff] %v4246_v8  ;;  %3133 = vmatpush3.msra.mxu0 %v4190_v45  ;;  %3160 = vmatpush3.msra.mxu1 %v4256_v14  ;;  %v286_v2 = vsub.f32 %v4296_v54, %v4324_v7 }
  0x3d   :  { %5528 = vst [vmem:[#allocation54_spill] sm:$0xff] %v4252_v13  ;;  %5529 = vst [vmem:[#allocation55_spill] sm:$0xff] %v4256_v14  ;;  %3134 = vmatprep.subr.mxu0 %v5386_v0  ;;  %3161 = vmatprep.subr.mxu1 %v5386_v0  ;;  %v272_v14 = vsub.f32 %v4265_v31, %v4293_v52 }
  0x3e   :  { %5530 = vst [vmem:[#allocation56_spill] sm:$0xff] %v4259_v19  ;;  %5531 = vst [vmem:[#allocation57_spill] sm:$0xff] %v4265_v31  ;;  %3135 = vmatpush3.msra.mxu0 %v4200_v48  ;;  %3162 = vmatpush3.msra.mxu1 %v4273_v33 }
  0x3f   :  { %5532 = vst [vmem:[#allocation58_spill] sm:$0xff] %v4269_v32  ;;  %5533 = vst [vmem:[#allocation59_spill] sm:$0xff] %v4273_v33  ;;  %3136 = vmatprep.subr.mxu0 %v5386_v0  ;;  %3163 = vmatprep.subr.mxu1 %v5386_v0  ;;  %v177_v33 = vsub.f32 %v4262_v26, %v5543_v36  ;;  %v4335_v36 = vand.u32 4294901760, %v4310_v50  ;;  %v4341_v56 = vand.u32 4294901760, %v272_v14  ;;  %v4356_v14 = vand.u32 4294901760, %v286_v2 }
  0x40   :  { %5534 = vst [vmem:[#allocation60_spill] sm:$0xff] %v4278_v39  ;;  %5535 = vst [vmem:[#allocation61_spill] sm:$0xff] %v4281_v41  ;;  %3137 = vmatpush3.msra.mxu0 %v4225_v59  ;;  %3164 = vmatpush3.msra.mxu1 %v4285_v42 }
  0x41   :  { %5536 = vst [vmem:[#allocation62_spill] sm:$0xff] %v4285_v42  ;;  %5537 = vst [vmem:[#allocation63_spill] sm:$0xff] %v4293_v52  ;;  %3138 = vmatprep.subr.mxu0 %v5386_v0  ;;  %3165 = vmatprep.subr.mxu1 %v5386_v0  ;;  %v279_v42 = vsub.f32 %v4281_v41, %v4307_v9  ;;  %v178_v1 = vand.u32 4294901760, %v177_v33  ;;  %v293_v51 = vsub.f32 %v4310_v50, %v4335_v36 }
  0x42   :  { %5538 = vst [vmem:[#allocation64_spill] sm:$0xff] %v4296_v54  ;;  %5539 = vst [vmem:[#allocation65_spill] sm:$0xff] %v4302_v58  ;;  %3139 = vmatpush3.msra.mxu0 %v4234_v63  ;;  %3166 = vmatpush3.msra.mxu1 %v4302_v58 }
  0x43   :  { %5540 = vst [vmem:[#allocation66_spill] sm:$0xff] %v4307_v9  ;;  %5541 = vst [vmem:[#allocation67_spill] sm:$0xff] %v4310_v50  ;;  %3140 = vmatprep.subr.mxu0 %v5386_v0  ;;  %3167 = vmatprep.subr.mxu1 %v5386_v0  ;;  %v4349_v58 = vand.u32 4294901760, %v279_v42  ;;  %v4362_v33 = vand.u32 4294901760, %v293_v51  ;;  %v5551_v51 = vand.u32 4294901760, %v4262_v26  ;;  %v91_v42 = vld [vmem:[#allocation7 + $0x70] sm:$0xff] }
  0x44   :  { %5542 = vst [vmem:[#allocation68_spill] sm:$0xff] %v4316_v60  ;;  %5544 = vst [vmem:[#allocation69_spill] sm:$0xff] %v4324_v7  ;;  %3141 = vmatpush3.msra.mxu0 %v4252_v13  ;;  %3168 = vmatpush3.msra.mxu1 %v4316_v60 }
  0x45   :  { %5545 = vst [vmem:[#allocation70_spill] sm:$0xff] %v4330_v49  ;;  %5546 = vst [vmem:[#allocation71_spill] sm:$0xff] %v4335_v36  ;;  %3142 = vmatprep.subr.mxu0 %v5386_v0  ;;  %3169 = vmatprep.subr.mxu1 %v5386_v0 }
  0x46   :  { %5547 = vst [vmem:[#allocation72_spill] sm:$0xff] %v4341_v56  ;;  %3143 = vmatpush3.msra.mxu0 %v4269_v32  ;;  %3170 = vmatpush3.msra.mxu1 %v4330_v49  ;;  %5548 = vst [vmem:[#allocation73_spill] sm:$0xff] %v4349_v58 }
  0x47   :  { %3171 = vmatprep.subr.mxu1 %v5386_v0  ;;  %3182 = vmatprep.subr.mxu0 %v5386_v0  ;;  %5549 = vst [vmem:[#allocation74_spill] sm:$0xff] %v4356_v14  ;;  %5550 = vst [vmem:[#allocation75_spill] sm:$0xff] %v4362_v33 }
  0x48   :  { %3145 = vmatmul.mubr.f32.vlgmr.msra.gmra.mxu0 %v178_v1  ;;  %3172 = vmatpush3.msra.mxu1 %v4341_v56  ;;  %v92_v1 = vld [vmem:[#allocation7 + $0x78] sm:$0xff]  ;;  %v77_v56 = vld [vmem:[#allocation7] sm:$0xff] }
  0x49   :  { %3183 = vmatpush3.msra.mxu0 %v4116_v15  ;;  %3173 = vmatprep.subr.mxu1 %v5386_v0  ;;  %v81_v15 = vld [vmem:[#allocation7 + $0x20] sm:$0xff]  ;;  %v4725_v49 = vand.u32 4294901760, %v77_v56 }
  0x4a   :  { %3184 = vmatprep.subr.mxu0 %v5386_v0  ;;  %3174 = vmatpush3.msra.mxu1 %v4349_v58 }
  0x4b   :  { %3185 = vmatpush3.msra.mxu0 %v4119_v16  ;;  %3175 = vmatprep.subr.mxu1 %v5386_v0 }
  0x4c   :  { %3186 = vmatprep.subr.mxu0 %v5386_v0  ;;  %3176 = vmatpush3.msra.mxu1 %v4356_v14 }
  0x4d   :  { %3187 = vmatpush3.msra.mxu0 %v4124_v18  ;;  %3177 = vmatprep.subr.mxu1 %v5386_v0 }
  0x4e   :  { %3188 = vmatprep.subr.mxu0 %v5386_v0  ;;  %3178 = vmatpush3.msra.mxu1 %v4362_v33 }
  0x4f   :  { %3189 = vmatpush3.msra.mxu0 %v4128_v20  ;;  %3180 = vmatmul.mubr.f32.vlgmr.msra.gmra.mxu1 %v4230_v62 }
  0x50   :  { %3190 = vmatprep.subr.mxu0 %v5386_v0  ;;  %3217 = vmatprep.subr.mxu1 %v5386_v0 }
  0x51   :  { %3191 = vmatpush3.msra.mxu0 %v4131_v21  ;;  %3218 = vmatpush3.msra.mxu1 %v4102_v4 }
  0x52   :  { %3192 = vmatprep.subr.mxu0 %v5386_v0  ;;  %3219 = vmatprep.subr.mxu1 %v5386_v0 }
  0x53   :  { %3193 = vmatpush3.msra.mxu0 %v4155_v30  ;;  %3220 = vmatpush3.msra.mxu1 %v4104_v5 }
  0x54   :  { %3194 = vmatprep.subr.mxu0 %v5386_v0  ;;  %3221 = vmatprep.subr.mxu1 %v5386_v0 }
  0x55   :  { %3195 = vmatpush3.msra.mxu0 %v4165_v34  ;;  %3222 = vmatpush3.msra.mxu1 %v4106_v6 }
  0x56   :  { %3196 = vmatprep.subr.mxu0 %v5386_v0  ;;  %3223 = vmatprep.subr.mxu1 %v5386_v0 }
  0x57   :  { %3197 = vmatpush3.msra.mxu0 %v4184_v43  ;;  %3224 = vmatpush3.msra.mxu1 %v4108_v10 }
  0x58   :  { %3198 = vmatprep.subr.mxu0 %v5386_v0  ;;  %3225 = vmatprep.subr.mxu1 %v5386_v0 }
  0x59   :  { %3199 = vmatpush3.msra.mxu0 %v4196_v47  ;;  %3226 = vmatpush3.msra.mxu1 %v4110_v11 }
  0x5a   :  { %3200 = vmatprep.subr.mxu0 %v5386_v0  ;;  %3227 = vmatprep.subr.mxu1 %v5386_v0 }
  0x5b   :  { %3201 = vmatpush3.msra.mxu0 %v4212_v55  ;;  %3228 = vmatpush3.msra.mxu1 %v4112_v12 }
  0x5c   :  { %3202 = vmatprep.subr.mxu0 %v5386_v0  ;;  %3229 = vmatprep.subr.mxu1 %v5386_v0 }
  0x5d   :  { %3203 = vmatpush3.msra.mxu0 %v4228_v61  ;;  %3230 = vmatpush3.msra.mxu1 %v4121_v17 }
  0x5e   :  { %3204 = vmatprep.subr.mxu0 %v5386_v0  ;;  %3231 = vmatprep.subr.mxu1 %v5386_v0 }
  0x5f   :  { %3205 = vmatpush3.msra.mxu0 %v4246_v8  ;;  %3232 = vmatpush3.msra.mxu1 %v4143_v25 }
  0x60   :  { %3206 = vmatprep.subr.mxu0 %v5386_v0  ;;  %3233 = vmatprep.subr.mxu1 %v5386_v0 }
  0x61   :  { %3207 = vmatpush3.msra.mxu0 %v4265_v31  ;;  %3234 = vmatpush3.msra.mxu1 %v4149_v28 }
  0x62   :  { %3208 = vmatprep.subr.mxu0 %v5386_v0  ;;  %3235 = vmatprep.subr.mxu1 %v5386_v0 }
  0x63   :  { %3209 = vmatpush3.msra.mxu0 %v4281_v41  ;;  %3236 = vmatpush3.msra.mxu1 %v4168_v35 }
  0x64   :  { %3210 = vmatprep.subr.mxu0 %v5386_v0  ;;  %3237 = vmatprep.subr.mxu1 %v5386_v0 }
  0x65   :  { %3211 = vmatpush3.msra.mxu0 %v4296_v54  ;;  %3238 = vmatpush3.msra.mxu1 %v4190_v45  ;;  %v5554_v54 = vmov 0.0  }
  0x66   :  { %3212 = vmatprep.subr.mxu0 %v5386_v0  ;;  %3239 = vmatprep.subr.mxu1 %v5386_v0 }
  0x67   :  { %3213 = vmatpush3.msra.mxu0 %v4310_v50  ;;  %3214 = vmatprep.mubr.msk.f32.mxu0 %vm4055_vm0, %v5386_v0 }
  0x68   :  { %3240 = vmatpush3.msra.mxu1 %v4200_v48  ;;  %3215 = vmatmul.mubr.f32.vlgmr.msra.gmra.mxu0 %v4262_v26  ;;  %v4513_v26 = vand.u32 4294901760, %v92_v1 }
  0x69   :  { %3241 = vmatprep.subr.mxu1 %v5386_v0  ;;  %3252 = vmatprep.subr.mxu0 %v5386_v0 }
  0x6a   :  { %3242 = vmatpush3.msra.mxu1 %v4225_v59  ;;  %3253 = vmatpush3.msra.mxu0 %v4135_v22  ;;  %v4516_v2 = vsub.f32 %v92_v1, %v4513_v26  ;;  %v87_v1 = vld [vmem:[#allocation7 + $0x50] sm:$0xff] }
  0x6b   :  { %3243 = vmatprep.subr.mxu1 %v5386_v0  ;;  %3254 = vmatprep.subr.mxu0 %v5386_v0 }
  0x6c   :  { %3244 = vmatpush3.msra.mxu1 %v4234_v63  ;;  %3255 = vmatpush3.msra.mxu0 %v4138_v23 }
  0x6d   :  { %3245 = vmatprep.subr.mxu1 %v5386_v0  ;;  %3256 = vmatprep.subr.mxu0 %v5386_v0 }
  0x6e   :  { %3246 = vmatpush3.msra.mxu1 %v4252_v13  ;;  %3257 = vmatpush3.msra.mxu0 %v4141_v24 }
  0x6f   :  { %3247 = vmatprep.subr.mxu1 %v5386_v0  ;;  %3258 = vmatprep.subr.mxu0 %v5386_v0 }
  0x70   :  { %3248 = vmatpush3.msra.mxu1 %v4269_v32  ;;  %3249 = vmatprep.mubr.msk.f32.mxu1 %vm4055_vm0, %v5386_v0 }
  0x71   :  { %3259 = vmatpush3.msra.mxu0 %v4147_v27  ;;  %3250 = vmatmul.mubr.f32.vlgmr.msra.gmra.mxu1 %v5551_v51  ;;  %v4518_v51 = vand.u32 4294901760, %v91_v42 }
  0x72   :  { %3260 = vmatprep.subr.mxu0 %v5386_v0  ;;  %3287 = vmatprep.subr.mxu1 %v5386_v0 }
  0x73   :  { %3261 = vmatpush3.msra.mxu0 %v4152_v29  ;;  %3288 = vmatpush3.msra.mxu1 %v4102_v4 }
  0x74   :  { %3262 = vmatprep.subr.mxu0 %v5386_v0  ;;  %3289 = vmatprep.subr.mxu1 %v5386_v0 }
  0x75   :  { %3263 = vmatpush3.msra.mxu0 %v4178_v40  ;;  %3290 = vmatpush3.msra.mxu1 %v4104_v5 }
  0x76   :  { %3264 = vmatprep.subr.mxu0 %v5386_v0  ;;  %3291 = vmatprep.subr.mxu1 %v5386_v0 }
  0x77   :  { %3265 = vmatpush3.msra.mxu0 %v4193_v46  ;;  %3292 = vmatpush3.msra.mxu1 %v4106_v6  ;;  %v4535_v46 = vand.u32 4294901760, %v87_v1 }
  0x78   :  { %3266 = vmatprep.subr.mxu0 %v5386_v0  ;;  %3293 = vmatprep.subr.mxu1 %v5386_v0 }
  0x79   :  { %3267 = vmatpush3.msra.mxu0 %v4209_v53  ;;  %3294 = vmatpush3.msra.mxu1 %v4108_v10  ;;  %v4558_v22 = vsub.f32 %v87_v1, %v4535_v46 }
  0x7a   :  { %3268 = vmatprep.subr.mxu0 %v5386_v0  ;;  %3295 = vmatprep.subr.mxu1 %v5386_v0 }
  0x7b   :  { %3269 = vmatpush3.msra.mxu0 %v4219_v57  ;;  %3296 = vmatpush3.msra.mxu1 %v4110_v11  ;;  %v85_v57 = vld [vmem:[#allocation7 + $0x40] sm:$0xff] }
  0x7c   :  { %3270 = vmatprep.subr.mxu0 %v5386_v0  ;;  %3297 = vmatprep.subr.mxu1 %v5386_v0  ;;  %v4540_v29 = vand.u32 4294901760, %v85_v57 }
  0x7d   :  { %3271 = vmatpush3.msra.mxu0 %v4243_v3  ;;  %3298 = vmatpush3.msra.mxu1 %v4112_v12  ;;  %v86_v3 = vld [vmem:[#allocation7 + $0x48] sm:$0xff] }
  0x7e   :  { %3272 = vmatprep.subr.mxu0 %v5386_v0  ;;  %3299 = vmatprep.subr.mxu1 %v5386_v0  ;;  %v4538_v40 = vand.u32 4294901760, %v86_v3  ;;  %v4565_v41 = vsub.f32 %v85_v57, %v4540_v29  ;;  %v4582_v57 = vand.u32 4294901760, %v4558_v22 }
  0x7f   :  { %3273 = vmatpush3.msra.mxu0 %v4259_v19  ;;  %3300 = vmatpush3.msra.mxu1 %v4121_v17 }
  0x80   :  { %3274 = vmatprep.subr.mxu0 %v5386_v0  ;;  %3301 = vmatprep.subr.mxu1 %v5386_v0  ;;  %v4561_v50 = vsub.f32 %v86_v3, %v4538_v40  ;;  %5559 = vst [vmem:[#allocation82_spill] sm:$0xff] %v4582_v57  ;;  %v4602_v34 = vand.u32 4294901760, %v4565_v41  ;;  %v865_v30 = vsub.f32 %v4558_v22, %v4582_v57 }
  0x81   :  { %3275 = vmatpush3.msra.mxu0 %v4278_v39  ;;  %3302 = vmatpush3.msra.mxu1 %v4143_v25 }
  0x82   :  { %3276 = vmatprep.subr.mxu0 %v5386_v0  ;;  %3303 = vmatprep.subr.mxu1 %v5386_v0  ;;  %5562 = vst [vmem:[#allocation85_spill] sm:$0xff] %v4602_v34 }
  0x83   :  { %3277 = vmatpush3.msra.mxu0 %v4293_v52  ;;  %3304 = vmatpush3.msra.mxu1 %v4149_v28  ;;  %v4526_v52 = vsub.f32 %v91_v42, %v4518_v51 }
  0x84   :  { %3278 = vmatprep.subr.mxu0 %v5386_v0  ;;  %3305 = vmatprep.subr.mxu1 %v5386_v0 }
  0x85   :  { %3279 = vmatpush3.msra.mxu0 %v4307_v9  ;;  %3306 = vmatpush3.msra.mxu1 %v4168_v35  ;;  %v88_v9 = vld [vmem:[#allocation7 + $0x58] sm:$0xff]  ;;  %v4545_v27 = vand.u32 4294901760, %v4526_v52 }
  0x86   :  { %3280 = vmatprep.subr.mxu0 %v5386_v0  ;;  %3307 = vmatprep.subr.mxu1 %v5386_v0  ;;  %v4533_v53 = vand.u32 4294901760, %v88_v9 }
  0x87   :  { %3281 = vmatpush3.msra.mxu0 %v4324_v7  ;;  %3308 = vmatpush3.msra.mxu1 %v4190_v45  ;;  %v89_v7 = vld [vmem:[#allocation7 + $0x60] sm:$0xff]  ;;  %5553 = vst [vmem:[#allocation77_spill] sm:$0xff] %v4545_v27  ;;  %v78_v45 = vld [vmem:[#allocation7 + $0x8] sm:$0xff] }
  0x88   :  { %3282 = vmatprep.subr.mxu0 %v5386_v0  ;;  %3309 = vmatprep.subr.mxu1 %v5386_v0  ;;  %v4530_v19 = vand.u32 4294901760, %v89_v7 }
  0x89   :  { %3283 = vmatpush3.msra.mxu0 %v4335_v36  ;;  %3284 = vmatprep.mubr.msk.f32.mxu0 %vm4055_vm0, %v5386_v0  ;;  %v90_v36 = vld [vmem:[#allocation7 + $0x68] sm:$0xff] }
  0x8a   :  { %3310 = vmatpush3.msra.mxu1 %v4200_v48  ;;  %3285 = vmatmul.mubr.f32.vlgmr.msra.gmra.mxu0 %v4230_v62  ;;  %v4528_v39 = vand.u32 4294901760, %v90_v36  ;;  %v4551_v23 = vsub.f32 %v89_v7, %v4530_v19  ;;  %v837_v7 = vsub.f32 %v4526_v52, %v4545_v27 }
  0x8b   :  { %3311 = vmatprep.subr.mxu1 %v5386_v0  ;;  %3319 = vmatprep.mubr.msk.f32.mxu1 %vm4055_vm0, %v5386_v0 }
  0x8c   :  { %3312 = vmatpush3.msra.mxu1 %v4225_v59  ;;  %3322 = vmatprep.subr.mxu0 %v5386_v0  ;;  %v4548_v24 = vsub.f32 %v90_v36, %v4528_v39  ;;  %v84_v36 = vld [vmem:[#allocation7 + $0x38] sm:$0xff]  ;;  %v4575_v1 = vand.u32 4294901760, %v4551_v23  ;;  %v4589_v8 = vand.u32 4294901760, %v837_v7  ;;  %v79_v59 = vld [vmem:[#allocation7 + $0x10] sm:$0xff] }
  0x8d   :  { %3313 = vmatprep.subr.mxu1 %v5386_v0  ;;  %3354 = vmatprep.mubr.msk.f32.mxu0 %vm4055_vm0, %v5386_v0  ;;  %v4596_v47 = vand.u32 4294901760, %v84_v36  ;;  %v4698_v14 = vand.u32 4294901760, %v79_v59 }
  0x8e   :  { %3314 = vmatpush3.msra.mxu1 %v4234_v63  ;;  %3323 = vmatpush3.msra.mxu0 %v4513_v26  ;;  %5557 = vst [vmem:[#allocation80_spill] sm:$0xff] %v4575_v1  ;;  %5561 = vst [vmem:[#allocation84_spill] sm:$0xff] %v4589_v8  ;;  %v851_v55 = vsub.f32 %v4551_v23, %v4575_v1 }
  0x8f   :  { %3315 = vmatprep.subr.mxu1 %v5386_v0  ;;  %3324 = vmatprep.subr.mxu0 %v5386_v0  ;;  %v4612_v21 = vsub.f32 %v84_v36, %v4596_v47  ;;  %v4629_v36 = vand.u32 4294901760, %v865_v30  ;;  %v82_v30 = vld [vmem:[#allocation7 + $0x28] sm:$0xff]  ;;  %v4714_v35 = vsub.f32 %v79_v59, %v4698_v14 }
  0x90   :  { %3316 = vmatpush3.msra.mxu1 %v4252_v13  ;;  %3325 = vmatpush3.msra.mxu0 %v4518_v51  ;;  %v80_v13 = vld [vmem:[#allocation7 + $0x18] sm:$0xff] }
  0x91   :  { %3317 = vmatprep.subr.mxu1 %v5386_v0  ;;  %3326 = vmatprep.subr.mxu0 %v5386_v0  ;;  %5567 = vst [vmem:[#allocation90_spill] sm:$0xff] %v4629_v36  ;;  %v4680_v63 = vand.u32 4294901760, %v80_v13  ;;  %5578 = vst [vmem:[#allocation101_spill] sm:$0xff] %v4714_v35  ;;  %v4730_v59 = vand.u32 4294901760, %v4714_v35 }
  0x92   :  { %3318 = vmatpush3.msra.mxu1 %v4269_v32  ;;  %3327 = vmatpush3.msra.mxu0 %v4528_v39 }
  0x93   :  { %3320 = vmatmul.mubr.f32.vlgmr.msra.gmra.mxu1 %v4230_v62  ;;  %3357 = vmatprep.subr.mxu1 %v5386_v0  ;;  %v4523_v62 = vand.u32 4294901760, %v4516_v2  ;;  %5581 = vst [vmem:[#allocation104_spill] sm:$0xff] %v4730_v59  ;;  %v921_v25 = vsub.f32 %v4714_v35, %v4730_v59 }
  0x94   :  { %3389 = vmatprep.mubr.msk.f32.mxu1 %vm4055_vm0, %v5386_v0  ;;  %v4555_v0 = vsub.f32 %v88_v9, %v4533_v53  ;;  %3328 = vmatprep.subr.mxu0 %v5554_v54  ;;  %v4572_v9 = vand.u32 4294901760, %v4548_v24 }
  0x95   :  { %5552 = vst [vmem:[#allocation76_spill] sm:$0xff] %v4523_v62  ;;  %v830_v42 = vsub.f32 %v4516_v2, %v4523_v62  ;;  %3329 = vmatpush3.msra.mxu0 %v4530_v19 }
  0x96   :  { %5556 = vst [vmem:[#allocation79_spill] sm:$0xff] %v4572_v9  ;;  %v4579_v3 = vand.u32 4294901760, %v4555_v0  ;;  %3330 = vmatprep.subr.mxu0 %v5554_v54  ;;  %v844_v61 = vsub.f32 %v4548_v24, %v4572_v9 }
  0x97   :  { %v4567_v31 = vand.u32 4294901760, %v830_v42  ;;  %v4585_v42 = vand.u32 4294901760, %v4561_v50  ;;  %3331 = vmatpush3.msra.mxu0 %v4533_v53 }
  0x98   :  { %5558 = vst [vmem:[#allocation81_spill] sm:$0xff] %v4579_v3  ;;  %v858_v43 = vsub.f32 %v4555_v0, %v4579_v3  ;;  %v4605_v7 = vand.u32 4294901760, %v844_v61  ;;  %3332 = vmatprep.subr.mxu0 %v5554_v54  ;;  %v4623_v61 = vand.u32 4294901760, %v4612_v21 }
  0x99   :  { %5555 = vst [vmem:[#allocation78_spill] sm:$0xff] %v4567_v31  ;;  %5560 = vst [vmem:[#allocation83_spill] sm:$0xff] %v4585_v42  ;;  %3358 = vmatpush3.msra.mxu1 %v4567_v31  ;;  %v4607_v31 = vand.u32 4294901760, %v851_v55  ;;  %3333 = vmatpush3.msra.mxu0 %v4535_v46  ;;  %v872_v55 = vsub.f32 %v4561_v50, %v4585_v42 }
  0x9a   :  { %3359 = vmatprep.subr.mxu1 %v5554_v54  ;;  %5563 = vst [vmem:[#allocation86_spill] sm:$0xff] %v4605_v7  ;;  %v4618_v20 = vand.u32 4294901760, %v858_v43  ;;  %5566 = vst [vmem:[#allocation89_spill] sm:$0xff] %v4623_v61  ;;  %3334 = vmatprep.subr.mxu0 %v5554_v54  ;;  %v879_v43 = vsub.f32 %v4565_v41, %v4602_v34  ;;  %v886_v18 = vsub.f32 %v4612_v21, %v4623_v61 }
  0x9b   :  { %3360 = vmatpush3.msra.mxu1 %v4589_v8  ;;  %5564 = vst [vmem:[#allocation87_spill] sm:$0xff] %v4607_v31  ;;  %3335 = vmatpush3.msra.mxu0 %v4538_v40  ;;  %v4637_v8 = vand.u32 4294901760, %v872_v55  ;;  %v4652_v55 = vand.u32 4294901760, %v82_v30 }
  0x9c   :  { %3361 = vmatprep.subr.mxu1 %v5554_v54  ;;  %5565 = vst [vmem:[#allocation88_spill] sm:$0xff] %v4618_v20  ;;  %3336 = vmatprep.subr.mxu0 %v5554_v54  ;;  %v4647_v16 = vand.u32 4294901760, %v879_v43  ;;  %v4658_v32 = vand.u32 4294901760, %v886_v18 }
  0x9d   :  { %3362 = vmatpush3.msra.mxu1 %v4605_v7  ;;  %v83_v7 = vld [vmem:[#allocation7 + $0x30] sm:$0xff]  ;;  %3337 = vmatpush3.msra.mxu0 %v4540_v29  ;;  %5568 = vst [vmem:[#allocation91_spill] sm:$0xff] %v4637_v8  ;;  %v4664_v43 = vsub.f32 %v82_v30, %v4652_v55 }
  0x9e   :  { %3363 = vmatprep.subr.mxu1 %v5554_v54  ;;  %3338 = vmatprep.subr.mxu0 %v5554_v54  ;;  %5569 = vst [vmem:[#allocation92_spill] sm:$0xff] %v4647_v16  ;;  %5570 = vst [vmem:[#allocation93_spill] sm:$0xff] %v4658_v32 }
  0x9f   :  { %3364 = vmatpush3.msra.mxu1 %v4607_v31  ;;  %v4641_v31 = vand.u32 4294901760, %v83_v7  ;;  %3339 = vmatpush3.msra.mxu0 %v4596_v47 }
  0xa0   :  { %3365 = vmatprep.subr.mxu1 %v5554_v54  ;;  %3340 = vmatprep.subr.mxu0 %v5554_v54 }
  0xa1   :  { %3366 = vmatpush3.msra.mxu1 %v4618_v20  ;;  %v4650_v20 = vsub.f32 %v83_v7, %v4641_v31  ;;  %3341 = vmatpush3.msra.mxu0 %v4641_v31  ;;  %v4666_v7 = vand.u32 4294901760, %v81_v15 }
  0xa2   :  { %3367 = vmatprep.subr.mxu1 %v5554_v54  ;;  %3342 = vmatprep.subr.mxu0 %v5554_v54 }
  0xa3   :  { %3368 = vmatpush3.msra.mxu1 %v4629_v36  ;;  %v4661_v36 = vand.u32 4294901760, %v4650_v20  ;;  %3343 = vmatpush3.msra.mxu0 %v4652_v55  ;;  %v4678_v30 = vsub.f32 %v81_v15, %v4666_v7  ;;  %v4694_v15 = vsub.f32 %v80_v13, %v4680_v63  ;;  %v4709_v13 = vand.u32 4294901760, %v78_v45 }
  0xa4   :  { %3369 = vmatprep.subr.mxu1 %v5554_v54  ;;  %3344 = vmatprep.subr.mxu0 %v5554_v54 }
  0xa5   :  { %3370 = vmatpush3.msra.mxu1 %v4637_v8  ;;  %5571 = vst [vmem:[#allocation94_spill] sm:$0xff] %v4661_v36  ;;  %v893_v18 = vsub.f32 %v4650_v20, %v4661_v36  ;;  %v4675_v8 = vand.u32 4294901760, %v4664_v43  ;;  %3345 = vmatpush3.msra.mxu0 %v4666_v7  ;;  %v4691_v48 = vand.u32 4294901760, %v4678_v30  ;;  %5575 = vst [vmem:[#allocation98_spill] sm:$0xff] %v4694_v15  ;;  %v4707_v58 = vand.u32 4294901760, %v4694_v15 }
  0xa6   :  { %3371 = vmatprep.subr.mxu1 %v5554_v54  ;;  %3346 = vmatprep.subr.mxu0 %v5554_v54  ;;  %v4723_v28 = vsub.f32 %v78_v45, %v4709_v13  ;;  %v4740_v45 = vsub.f32 %v77_v56, %v4725_v49  ;;  %v4755_v56 = vand.u32 4294901760, %v921_v25 }
  0xa7   :  { %3372 = vmatpush3.msra.mxu1 %v4647_v16  ;;  %5572 = vst [vmem:[#allocation95_spill] sm:$0xff] %v4675_v8  ;;  %v4686_v16 = vand.u32 4294901760, %v893_v18  ;;  %v900_v33 = vsub.f32 %v4664_v43, %v4675_v8  ;;  %5574 = vst [vmem:[#allocation97_spill] sm:$0xff] %v4691_v48  ;;  %3347 = vmatpush3.msra.mxu0 %v4680_v63 }
  0xa8   :  { %3373 = vmatprep.subr.mxu1 %v5554_v54  ;;  %5577 = vst [vmem:[#allocation100_spill] sm:$0xff] %v4707_v58  ;;  %3348 = vmatprep.subr.mxu0 %v5554_v54  ;;  %5580 = vst [vmem:[#allocation103_spill] sm:$0xff] %v4723_v28 }
  0xa9   :  { %3374 = vmatpush3.msra.mxu1 %v4658_v32  ;;  %5573 = vst [vmem:[#allocation96_spill] sm:$0xff] %v4686_v16  ;;  %v4702_v18 = vand.u32 4294901760, %v900_v33  ;;  %v907_v32 = vsub.f32 %v4678_v30, %v4691_v48  ;;  %3349 = vmatpush3.msra.mxu0 %v4698_v14  ;;  %5584 = vst [vmem:[#allocation107_spill] sm:$0xff] %v4740_v45 }
  0xaa   :  { %3375 = vmatprep.subr.mxu1 %v5554_v54  ;;  %3350 = vmatprep.subr.mxu0 %v5554_v54  ;;  %5586 = vst [vmem:[#allocation109_spill] sm:$0xff] %v4755_v56 }
  0xab   :  { %3376 = vmatpush3.msra.mxu1 %v4686_v16  ;;  %5576 = vst [vmem:[#allocation99_spill] sm:$0xff] %v4702_v18  ;;  %v4718_v33 = vand.u32 4294901760, %v907_v32  ;;  %v914_v16 = vsub.f32 %v4694_v15, %v4707_v58  ;;  %3351 = vmatpush3.msra.mxu0 %v4709_v13 }
  0xac   :  { %3377 = vmatprep.subr.mxu1 %v5554_v54  ;;  %3352 = vmatprep.subr.mxu0 %v5554_v54 }
  0xad   :  { %3378 = vmatpush3.msra.mxu1 %v4702_v18  ;;  %5579 = vst [vmem:[#allocation102_spill] sm:$0xff] %v4718_v33  ;;  %v4734_v32 = vand.u32 4294901760, %v914_v16  ;;  %v4737_v18 = vand.u32 4294901760, %v4723_v28  ;;  %3353 = vmatpush3.msra.mxu0 %v4725_v49 }
  0xae   :  { %3379 = vmatprep.subr.mxu1 %v5554_v54  ;;  %3392 = vmatprep.subr.mxu0 %v5554_v54 }
  0xaf   :  { %3380 = vmatpush3.msra.mxu1 %v4718_v33  ;;  %5582 = vst [vmem:[#allocation105_spill] sm:$0xff] %v4734_v32  ;;  %5583 = vst [vmem:[#allocation106_spill] sm:$0xff] %v4737_v18  ;;  %v928_v16 = vsub.f32 %v4723_v28, %v4737_v18  ;;  %v4751_v33 = vand.u32 4294901760, %v4740_v45 }
  0xb0   :  { %3381 = vmatprep.subr.mxu1 %v5554_v54 }
  0xb1   :  { %3382 = vmatpush3.msra.mxu1 %v4734_v32  ;;  %5585 = vst [vmem:[#allocation108_spill] sm:$0xff] %v4751_v33  ;;  %v4757_v60 = vand.u32 4294901760, %v928_v16  ;;  %v935_v17 = vsub.f32 %v4740_v45, %v4751_v33 }
  0xb2   :  { %3383 = vmatprep.subr.mxu1 %v5554_v54 }
  0xb3   :  { %5587 = vst [vmem:[#allocation110_spill] sm:$0xff] %v4757_v60  ;;  %3384 = vmatpush3.msra.mxu1 %v4755_v56  ;;  %v4763_v32 = vand.u32 4294901760, %v935_v17 }
  0xb4   :  { %3385 = vmatprep.subr.mxu1 %v5554_v54 }
  0xb5   :  { %5588 = vst [vmem:[#allocation111_spill] sm:$0xff] %v4763_v32  ;;  %3386 = vmatpush3.msra.mxu1 %v4757_v60 }
  0xb6   :  { %3387 = vmatprep.subr.mxu1 %v5554_v54 }
  0xb7   :  { %3388 = vmatpush3.msra.mxu1 %v4763_v32 }
  0xb8   :  { %3427 = vmatprep.subr.mxu1 %v5554_v54 }
 0x108   :  { %v180_v25 = vpop.f32.mrf.mxu0 }
 0x10a   :  { %v3146_v16 = vpop.f32.mrf.mxu0 }
 0x10f   :  { %v331_v12 = vpop.f32.mrf.mxu1 }
 0x110   :  { %v332_v44 = vadd.f32 %v331_v12, %v180_v25  ;;  %v5591_v12 = vld [vmem:[#allocation34_spill] sm:$0xff]  ;;  %v5602_v25 = vld [vmem:[#allocation55_spill] sm:$0xff] }
 0x111   :  { %v3181_v11 = vpop.f32.mrf.mxu1 }
 0x112   :  { %v5590_v11 = vld [vmem:[#allocation104_spill] sm:$0xff] }
 0x128   :  { %v435_v10 = vpop.f32.mrf.mxu0 }
 0x129   :  { %v436_v33 = vadd.f32 %v435_v10, %v332_v44  ;;  %v5589_v10 = vld [vmem:[#allocation100_spill] sm:$0xff] }
 0x12a   :  { %v3216_v6 = vpop.f32.mrf.mxu0  ;;  %v5594_v44 = vld [vmem:[#allocation108_spill] sm:$0xff] }
 0x131   :  { %v524_v5 = vpop.f32.mrf.mxu1 }
 0x132   :  { %v525_v38 = vadd.f32 %v524_v5, %v436_v33  ;;  %v5597_v33 = vld [vmem:[#allocation12_spill] sm:$0xff] }
 0x133   :  { %v3251_v56 = vpop.f32.mrf.mxu1 }
 0x134   :  { %v5600_v56 = vld [vmem:[#allocation51_spill] sm:$0xff] }
 0x14a   :  { %v643_v4 = vpop.f32.mrf.mxu0 }
 0x14b   :  { %v644_v60 = vadd.f32 %v643_v4, %v525_v38  ;;  %v5593_v38 = vld [vmem:[#allocation35_spill] sm:$0xff] }
 0x14c   :  { %v3286_v17 = vpop.f32.mrf.mxu0 }
 0x14d   :  { %v5603_v17 = vld [vmem:[#allocation15_spill] sm:$0xff] }
 0x153   :  { %v730_v18 = vpop.f32.mrf.mxu1 }
 0x154   :  { %v731_v37 = vadd.f32 %v730_v18, %v644_v60  ;;  %v5595_v60 = vld [vmem:[#allocation38_spill] sm:$0xff]  ;;  %v5596_v18 = vld [vmem:[#allocation43_spill] sm:$0xff] }
 0x155   :  { %v3321_v59 = vpop.f32.mrf.mxu1 }
 0x156   :  { %v734_v32 = vmul.f32 0.03125, %v731_v37  ;;  %v5592_v37 = vld [vmem:[#allocation106_spill] sm:$0xff] }
 0x157   :  { %v5598_v59 = vld [vmem:[#allocation46_spill] sm:$0xff] }
 0x158   :  { %v4769_v58 = vand.u32 4294901760, %v734_v32 }
 0x15a   :  { %v4772_v16 = vsub.f32 %v734_v32, %v4769_v58  ;;  %3390 = vmatmul.mubr.f32.vlgmr.msra.gmra.mxu1 %v4769_v58  ;;  %v5599_v32 = vld [vmem:[#allocation13_spill] sm:$0xff] }
 0x15b   :  { %3428 = vmatpush3.msra.mxu1 %v4513_v26  ;;  %3459 = vmatprep.mubr.msk.f32.mxu1 %vm4055_vm0, %v5554_v54 }
 0x15c   :  { %v818_v6 = vand.u32 4294901760, %v4772_v16  ;;  %3429 = vmatprep.subr.mxu1 %v5554_v54 }
 0x15d   :  { %3430 = vmatpush3.msra.mxu1 %v4518_v51 }
 0x15e   :  { %v819_v4 = vsub.f32 %v4772_v16, %v818_v6  ;;  %3431 = vmatprep.subr.mxu1 %v5554_v54 }
 0x15f   :  { %3432 = vmatpush3.msra.mxu1 %v4528_v39 }
 0x160   :  { %3433 = vmatprep.subr.mxu1 %v5554_v54  ;;  %v820_v5 = vand.u32 4294901760, %v819_v4  ;;  %v5606_v4 = vld [vmem:[#allocation62_spill] sm:$0xff] }
 0x161   :  { %3434 = vmatpush3.msra.mxu1 %v4530_v19 }
 0x162   :  { %3435 = vmatprep.subr.mxu1 %v5554_v54  ;;  %3355 = vmatmul.mubr.f32.vlgmr.msra.gmra.mxu0 %v820_v5  ;;  %v5607_v5 = vld [vmem:[#allocation17_spill] sm:$0xff] }
 0x163   :  { %3393 = vmatpush3.msra.mxu0 %v4516_v2  ;;  %3436 = vmatpush3.msra.mxu1 %v4533_v53 }
 0x164   :  { %3394 = vmatprep.subr.mxu0 %v5554_v54  ;;  %3437 = vmatprep.subr.mxu1 %v5554_v54 }
 0x165   :  { %3395 = vmatpush3.msra.mxu0 %v4526_v52  ;;  %3438 = vmatpush3.msra.mxu1 %v4535_v46 }
 0x166   :  { %3396 = vmatprep.subr.mxu0 %v5554_v54  ;;  %3439 = vmatprep.subr.mxu1 %v5554_v54 }
 0x167   :  { %3397 = vmatpush3.msra.mxu0 %v4548_v24  ;;  %3440 = vmatpush3.msra.mxu1 %v4538_v40 }
 0x168   :  { %3398 = vmatprep.subr.mxu0 %v5554_v54  ;;  %3441 = vmatprep.subr.mxu1 %v5554_v54 }
 0x169   :  { %3399 = vmatpush3.msra.mxu0 %v4551_v23  ;;  %3442 = vmatpush3.msra.mxu1 %v4540_v29 }
 0x16a   :  { %3400 = vmatprep.subr.mxu0 %v5554_v54  ;;  %3443 = vmatprep.subr.mxu1 %v5554_v54 }
 0x16b   :  { %3401 = vmatpush3.msra.mxu0 %v4555_v0  ;;  %3444 = vmatpush3.msra.mxu1 %v4596_v47 }
 0x16c   :  { %3402 = vmatprep.subr.mxu0 %v5554_v54  ;;  %3445 = vmatprep.subr.mxu1 %v5554_v54 }
 0x16d   :  { %3403 = vmatpush3.msra.mxu0 %v4558_v22  ;;  %3446 = vmatpush3.msra.mxu1 %v4641_v31 }
 0x16e   :  { %3404 = vmatprep.subr.mxu0 %v5554_v54  ;;  %3447 = vmatprep.subr.mxu1 %v5554_v54 }
 0x16f   :  { %3405 = vmatpush3.msra.mxu0 %v4561_v50  ;;  %3448 = vmatpush3.msra.mxu1 %v4652_v55 }
 0x170   :  { %3406 = vmatprep.subr.mxu0 %v5554_v54  ;;  %3449 = vmatprep.subr.mxu1 %v5554_v54 }
 0x171   :  { %3407 = vmatpush3.msra.mxu0 %v4565_v41  ;;  %3450 = vmatpush3.msra.mxu1 %v4666_v7 }
 0x172   :  { %3408 = vmatprep.subr.mxu0 %v5554_v54  ;;  %3451 = vmatprep.subr.mxu1 %v5554_v54 }
 0x173   :  { %3409 = vmatpush3.msra.mxu0 %v4612_v21  ;;  %3452 = vmatpush3.msra.mxu1 %v4680_v63 }
 0x174   :  { %3410 = vmatprep.subr.mxu0 %v5554_v54  ;;  %3453 = vmatprep.subr.mxu1 %v5554_v54 }
 0x175   :  { %3411 = vmatpush3.msra.mxu0 %v4650_v20  ;;  %3454 = vmatpush3.msra.mxu1 %v4698_v14 }
 0x176   :  { %3412 = vmatprep.subr.mxu0 %v5554_v54  ;;  %3455 = vmatprep.subr.mxu1 %v5554_v54 }
 0x177   :  { %3413 = vmatpush3.msra.mxu0 %v4664_v43  ;;  %3456 = vmatpush3.msra.mxu1 %v4709_v13 }
 0x178   :  { %3414 = vmatprep.subr.mxu0 %v5554_v54  ;;  %3457 = vmatprep.subr.mxu1 %v5554_v54 }
 0x179   :  { %3415 = vmatpush3.msra.mxu0 %v4678_v30  ;;  %3458 = vmatpush3.msra.mxu1 %v4725_v49 }
 0x17a   :  { %3416 = vmatprep.subr.mxu0 %v5554_v54  ;;  %3460 = vmatmul.mubr.f32.vlgmr.msra.gmra.mxu1 %v818_v6  ;;  %v5605_v6 = vld [vmem:[#allocation16_spill] sm:$0xff] }
 0x17b   :  { %3497 = vmatprep.subr.mxu1 %v5554_v54  ;;  %3417 = vmatpush3.msra.mxu0 %v4694_v15 }
 0x17c   :  { %3498 = vmatpush3.msra.mxu1 %v4513_v26  ;;  %3418 = vmatprep.subr.mxu0 %v5554_v54 }
 0x17d   :  { %3499 = vmatprep.subr.mxu1 %v5554_v54  ;;  %3419 = vmatpush3.msra.mxu0 %v4714_v35  ;;  %v3962_v35 = vld [vmem:[#allocation2] sm:$0xf] }
 0x17e   :  { %3500 = vmatpush3.msra.mxu1 %v4518_v51  ;;  %3420 = vmatprep.subr.mxu0 %v5554_v54 }
 0x17f   :  { %3501 = vmatprep.subr.mxu1 %v5554_v54  ;;  %3421 = vmatpush3.msra.mxu0 %v4723_v28 }
 0x180   :  { %3502 = vmatpush3.msra.mxu1 %v4528_v39  ;;  %3422 = vmatprep.subr.mxu0 %v5554_v54 }
 0x181   :  { %3503 = vmatprep.subr.mxu1 %v5554_v54  ;;  %3423 = vmatpush3.msra.mxu0 %v4740_v45 }
 0x182   :  { %3424 = vmatprep.mubr.msk.f32.mxu0 %vm4055_vm0, %v5554_v54  ;;  %3504 = vmatpush3.msra.mxu1 %v4530_v19 }
 0x183   :  { %3425 = vmatmul.mubr.f32.vlgmr.msra.gmra.mxu0 %v4772_v16  ;;  %3462 = vmatprep.subr.mxu0 %v5554_v54  ;;  %v5604_v16 = vld [vmem:[#allocation59_spill] sm:$0xff] }
 0x184   :  { %3505 = vmatprep.subr.mxu1 %v5554_v54  ;;  %3463 = vmatpush3.msra.mxu0 %v4523_v62 }
 0x185   :  { %3506 = vmatpush3.msra.mxu1 %v4533_v53  ;;  %3464 = vmatprep.subr.mxu0 %v5554_v54 }
 0x186   :  { %3507 = vmatprep.subr.mxu1 %v5554_v54  ;;  %3465 = vmatpush3.msra.mxu0 %v4545_v27 }
 0x187   :  { %3508 = vmatpush3.msra.mxu1 %v4535_v46  ;;  %3466 = vmatprep.subr.mxu0 %v5554_v54 }
 0x188   :  { %3509 = vmatprep.subr.mxu1 %v5554_v54  ;;  %3467 = vmatpush3.msra.mxu0 %v4572_v9 }
 0x189   :  { %3510 = vmatpush3.msra.mxu1 %v4538_v40  ;;  %3468 = vmatprep.subr.mxu0 %v5554_v54 }
 0x18a   :  { %3511 = vmatprep.subr.mxu1 %v5554_v54  ;;  %3469 = vmatpush3.msra.mxu0 %v4575_v1 }
 0x18b   :  { %3512 = vmatpush3.msra.mxu1 %v4540_v29  ;;  %3470 = vmatprep.subr.mxu0 %v5554_v54 }
 0x18c   :  { %3513 = vmatprep.subr.mxu1 %v5554_v54  ;;  %3471 = vmatpush3.msra.mxu0 %v4579_v3 }
 0x18d   :  { %3514 = vmatpush3.msra.mxu1 %v4596_v47  ;;  %3472 = vmatprep.subr.mxu0 %v5554_v54 }
 0x18e   :  { %3515 = vmatprep.subr.mxu1 %v5554_v54  ;;  %3473 = vmatpush3.msra.mxu0 %v4582_v57 }
 0x18f   :  { %3516 = vmatpush3.msra.mxu1 %v4641_v31  ;;  %3474 = vmatprep.subr.mxu0 %v5554_v54 }
 0x190   :  { %3517 = vmatprep.subr.mxu1 %v5554_v54  ;;  %3475 = vmatpush3.msra.mxu0 %v4585_v42 }
 0x191   :  { %3518 = vmatpush3.msra.mxu1 %v4652_v55  ;;  %3476 = vmatprep.subr.mxu0 %v5554_v54 }
 0x192   :  { %3519 = vmatprep.subr.mxu1 %v5554_v54  ;;  %3477 = vmatpush3.msra.mxu0 %v4602_v34 }
 0x193   :  { %3520 = vmatpush3.msra.mxu1 %v4666_v7  ;;  %3478 = vmatprep.subr.mxu0 %v5554_v54 }
 0x194   :  { %3521 = vmatprep.subr.mxu1 %v5554_v54  ;;  %3479 = vmatpush3.msra.mxu0 %v4623_v61 }
 0x195   :  { %3522 = vmatpush3.msra.mxu1 %v4680_v63  ;;  %3480 = vmatprep.subr.mxu0 %v5554_v54 }
 0x196   :  { %3523 = vmatprep.subr.mxu1 %v5554_v54  ;;  %3481 = vmatpush3.msra.mxu0 %v4661_v36 }
 0x197   :  { %3524 = vmatpush3.msra.mxu1 %v4698_v14  ;;  %3482 = vmatprep.subr.mxu0 %v5554_v54 }
 0x198   :  { %3525 = vmatprep.subr.mxu1 %v5554_v54  ;;  %3483 = vmatpush3.msra.mxu0 %v4675_v8 }
 0x199   :  { %3526 = vmatpush3.msra.mxu1 %v4709_v13  ;;  %3484 = vmatprep.subr.mxu0 %v5554_v54 }
 0x19a   :  { %3527 = vmatprep.subr.mxu1 %v5554_v54  ;;  %3485 = vmatpush3.msra.mxu0 %v4691_v48 }
 0x19b   :  { %3528 = vmatpush3.msra.mxu1 %v4725_v49  ;;  %3529 = vmatprep.mubr.msk.f32.mxu1 %vm4055_vm0, %v5554_v54 }
 0x19c   :  { %3486 = vmatprep.subr.mxu0 %v5554_v54  ;;  %3530 = vmatmul.mubr.f32.vlgmr.msra.gmra.mxu1 %v4769_v58 }
 0x19d   :  { %3487 = vmatpush3.msra.mxu0 %v5589_v10  ;;  %3494 = vmatprep.mubr.msk.f32.mxu0 %vm4055_vm0, %v5554_v54 }
 0x19e   :  { %3488 = vmatprep.subr.mxu0 %v5554_v54  ;;  %3567 = vmatprep.subr.mxu1 %v5554_v54 }
 0x19f   :  { %3489 = vmatpush3.msra.mxu0 %v5590_v11  ;;  %3568 = vmatpush3.msra.mxu1 %v5591_v12  ;;  %v5608_v12 = vld [vmem:[#allocation65_spill] sm:$0xff] }
 0x1a0   :  { %3490 = vmatprep.subr.mxu0 %v5554_v54  ;;  %3569 = vmatprep.subr.mxu1 %v5554_v54 }
 0x1a1   :  { %3491 = vmatpush3.msra.mxu0 %v5592_v37  ;;  %3570 = vmatpush3.msra.mxu1 %v5593_v38  ;;  %v5609_v38 = vld [vmem:[#allocation20_spill] sm:$0xff] }
 0x1a2   :  { %3492 = vmatprep.subr.mxu0 %v5554_v54  ;;  %3571 = vmatprep.subr.mxu1 %v5554_v54 }
 0x1a3   :  { %3493 = vmatpush3.msra.mxu0 %v5594_v44  ;;  %3572 = vmatpush3.msra.mxu1 %v5595_v60  ;;  %v5610_v60 = vld [vmem:[#allocation68_spill] sm:$0xff]  ;;  %v5623_v44 = vld [vmem:[#allocation54_spill] sm:$0xff] }
 0x1a4   :  { %3495 = vmatmul.mubr.f32.vlgmr.msra.gmra.mxu0 %v4769_v58  ;;  %3573 = vmatprep.subr.mxu1 %v5554_v54  ;;  %v5601_v58 = vld [vmem:[#allocation14_spill] sm:$0xff] }
 0x1a5   :  { %3574 = vmatpush3.msra.mxu1 %v5596_v18  ;;  %3532 = vmatprep.subr.mxu0 %v5554_v54  ;;  %v5611_v18 = vld [vmem:[#allocation27_spill] sm:$0xff] }
 0x1a6   :  { %3575 = vmatprep.subr.mxu1 %v5554_v54  ;;  %3533 = vmatpush3.msra.mxu0 %v5597_v33 }
 0x1a7   :  { %3576 = vmatpush3.msra.mxu1 %v5598_v59  ;;  %3534 = vmatprep.subr.mxu0 %v5554_v54  ;;  %v5612_v59 = vld [vmem:[#allocation70_spill] sm:$0xff] }
 0x1a8   :  { %3577 = vmatprep.subr.mxu1 %v5554_v54  ;;  %3535 = vmatpush3.msra.mxu0 %v5599_v32 }
 0x1a9   :  { %3578 = vmatpush3.msra.mxu1 %v5600_v56  ;;  %3536 = vmatprep.subr.mxu0 %v5554_v54  ;;  %v5613_v56 = vld [vmem:[#allocation29_spill] sm:$0xff] }
 0x1aa   :  { %3579 = vmatprep.subr.mxu1 %v5554_v54  ;;  %3537 = vmatpush3.msra.mxu0 %v5601_v58 }
 0x1ab   :  { %3580 = vmatpush3.msra.mxu1 %v5602_v25  ;;  %3538 = vmatprep.subr.mxu0 %v5554_v54  ;;  %v5614_v25 = vld [vmem:[#allocation72_spill] sm:$0xff] }
 0x1ac   :  { %3581 = vmatprep.subr.mxu1 %v5554_v54  ;;  %3539 = vmatpush3.msra.mxu0 %v5603_v17 }
 0x1ad   :  { %3582 = vmatpush3.msra.mxu1 %v5604_v16  ;;  %3540 = vmatprep.subr.mxu0 %v5554_v54  ;;  %v5615_v16 = vld [vmem:[#allocation33_spill] sm:$0xff] }
 0x1ae   :  { %3583 = vmatprep.subr.mxu1 %v5554_v54  ;;  %3541 = vmatpush3.msra.mxu0 %v5605_v6 }
 0x1af   :  { %3584 = vmatpush3.msra.mxu1 %v5606_v4  ;;  %3542 = vmatprep.subr.mxu0 %v5554_v54  ;;  %v5616_v4 = vld [vmem:[#allocation73_spill] sm:$0xff] }
 0x1b0   :  { %3585 = vmatprep.subr.mxu1 %v5554_v54  ;;  %3543 = vmatpush3.msra.mxu0 %v5607_v5 }
 0x1b1   :  { %3586 = vmatpush3.msra.mxu1 %v5608_v12  ;;  %3544 = vmatprep.subr.mxu0 %v5554_v54  ;;  %v5617_v12 = vld [vmem:[#allocation39_spill] sm:$0xff] }
 0x1b2   :  { %3587 = vmatprep.subr.mxu1 %v5554_v54  ;;  %3545 = vmatpush3.msra.mxu0 %v5609_v38 }
 0x1b3   :  { %3588 = vmatpush3.msra.mxu1 %v5610_v60  ;;  %3546 = vmatprep.subr.mxu0 %v5554_v54  ;;  %v5618_v60 = vld [vmem:[#allocation74_spill] sm:$0xff] }
 0x1b4   :  { %3589 = vmatprep.subr.mxu1 %v5554_v54  ;;  %3547 = vmatpush3.msra.mxu0 %v5611_v18 }
 0x1b5   :  { %3590 = vmatpush3.msra.mxu1 %v5612_v59  ;;  %3548 = vmatprep.subr.mxu0 %v5554_v54  ;;  %v5619_v59 = vld [vmem:[#allocation42_spill] sm:$0xff] }
 0x1b6   :  { %3591 = vmatprep.subr.mxu1 %v5554_v54  ;;  %3549 = vmatpush3.msra.mxu0 %v5613_v56 }
 0x1b7   :  { %3592 = vmatpush3.msra.mxu1 %v5614_v25  ;;  %3550 = vmatprep.subr.mxu0 %v5554_v54  ;;  %v5620_v25 = vld [vmem:[#allocation75_spill] sm:$0xff] }
 0x1b8   :  { %3593 = vmatprep.subr.mxu1 %v5554_v54  ;;  %3551 = vmatpush3.msra.mxu0 %v5615_v16 }
 0x1b9   :  { %3594 = vmatpush3.msra.mxu1 %v5616_v4  ;;  %3552 = vmatprep.subr.mxu0 %v5554_v54  ;;  %v5621_v4 = vld [vmem:[#allocation48_spill] sm:$0xff] }
 0x1ba   :  { %3595 = vmatprep.subr.mxu1 %v5554_v54  ;;  %3553 = vmatpush3.msra.mxu0 %v5617_v12 }
 0x1bb   :  { %3596 = vmatpush3.msra.mxu1 %v5618_v60  ;;  %3554 = vmatprep.subr.mxu0 %v5554_v54  ;;  %v5622_v60 = vld [vmem:[#allocation50_spill] sm:$0xff] }
 0x1bc   :  { %3597 = vmatprep.subr.mxu1 %v5554_v54  ;;  %3555 = vmatpush3.msra.mxu0 %v5619_v59 }
 0x1bd   :  { %3598 = vmatpush3.msra.mxu1 %v5620_v25  ;;  %3556 = vmatprep.subr.mxu0 %v5554_v54  ;;  %v5624_v25 = vld [vmem:[#allocation58_spill] sm:$0xff] }
 0x1be   :  { %3599 = vmatprep.mubr.msk.f32.mxu1 %vm4055_vm0, %v5554_v54  ;;  %3637 = vmatprep.subr.mxu1 %v5554_v54 }
 0x1bf   :  { %3557 = vmatpush3.msra.mxu0 %v5621_v4  ;;  %3564 = vmatprep.mubr.msk.f32.mxu0 %vm4055_vm0, %v5554_v54 }
 0x1c0   :  { %3558 = vmatprep.subr.mxu0 %v5554_v54 }
 0x1c1   :  { %3559 = vmatpush3.msra.mxu0 %v5622_v60 }
 0x1c2   :  { %3560 = vmatprep.subr.mxu0 %v5554_v54 }
 0x1c3   :  { %3561 = vmatpush3.msra.mxu0 %v5623_v44 }
 0x1c4   :  { %3562 = vmatprep.subr.mxu0 %v5554_v54 }
 0x1c5   :  { %3563 = vmatpush3.msra.mxu0 %v5624_v25 }
 0x1c6   :  { %3602 = vmatprep.subr.mxu0 %v5554_v54 }
 0x21a   :  { %v973_v37 = vpop.f32.mrf.mxu1 }
 0x21c   :  { %v3391_v11 = vpop.f32.mrf.mxu1 }
 0x222   :  { %v822_v10 = vpop.f32.mrf.mxu0 }
 0x223   :  { %v974_v57 = vadd.f32 %v973_v37, %v822_v10  ;;  %v5635_v10 = vld [vmem:[#allocation49_spill] sm:$0xff] }
 0x224   :  { %v3356_v48 = vpop.f32.mrf.mxu0  ;;  %v5636_v37 = vld [vmem:[#allocation53_spill] sm:$0xff] }
 0x23a   :  { %v1166_v8 = vpop.f32.mrf.mxu1 }
 0x23c   :  { %v3461_v36 = vpop.f32.mrf.mxu1 }
 0x23d   :  { %v5633_v36 = vld [vmem:[#allocation41_spill] sm:$0xff] }
 0x243   :  { %v1077_v61 = vpop.f32.mrf.mxu0 }
 0x244   :  { %v1078_v1 = vadd.f32 %v1077_v61, %v974_v57  ;;  %v5630_v57 = vld [vmem:[#allocation31_spill] sm:$0xff]  ;;  %v5632_v61 = vld [vmem:[#allocation37_spill] sm:$0xff] }
 0x245   :  { %v3426_v34 = vpop.f32.mrf.mxu0 }
 0x246   :  { %v1167_v9 = vadd.f32 %v1166_v8, %v1078_v1  ;;  %v5625_v8 = vld [vmem:[#allocation18_spill] sm:$0xff] }
 0x247   :  { %v5628_v1 = vld [vmem:[#allocation22_spill] sm:$0xff] }
 0x25c   :  { %v1372_v42 = vpop.f32.mrf.mxu1 }
 0x25e   :  { %v3531_v3 = vpop.f32.mrf.mxu1 }
 0x25f   :  { %v5629_v3 = vld [vmem:[#allocation23_spill] sm:$0xff] }
 0x264   :  { %v1285_v27 = vpop.f32.mrf.mxu0 }
 0x265   :  { %v1286_v62 = vadd.f32 %v1285_v27, %v1167_v9  ;;  %v5627_v9 = vld [vmem:[#allocation21_spill] sm:$0xff] }
 0x266   :  { %v3496_v45 = vpop.f32.mrf.mxu0 }
 0x267   :  { %v1373_v28 = vadd.f32 %v1372_v42, %v1286_v62  ;;  %v5626_v62 = vld [vmem:[#allocation19_spill] sm:$0xff]  ;;  %v5631_v42 = vld [vmem:[#allocation32_spill] sm:$0xff]  ;;  %v5634_v45 = vld [vmem:[#allocation45_spill] sm:$0xff] }
 0x269   :  { %v4984_v15 = vsub.f32 %v3962_v35, %v1373_v28 }
 0x26b   :  { %v1377_v11 = vmul.f32 %v4984_v15, %v4984_v15 }
 0x26d   :  { %v4988_v48 = vand.u32 4294901760, %v1377_v11 }
 0x26f   :  { %3600 = vmatmul.mubr.f32.vlgmr.msra.gmra.mxu1 %v4988_v48  ;;  %v4992_v34 = vsub.f32 %v1377_v11, %v4988_v48  ;;  %v5637_v11 = vld [vmem:[#allocation57_spill] sm:$0xff] }
 0x270   :  { %3638 = vmatpush3.msra.mxu1 %v5597_v33  ;;  %3669 = vmatprep.mubr.msk.f32.mxu1 %vm4055_vm0, %v5554_v54 }
 0x271   :  { %3639 = vmatprep.subr.mxu1 %v5554_v54  ;;  %v1461_v27 = vand.u32 4294901760, %v4992_v34 }
 0x272   :  { %3640 = vmatpush3.msra.mxu1 %v5599_v32 }
 0x273   :  { %3641 = vmatprep.subr.mxu1 %v5554_v54  ;;  %v1462_v28 = vsub.f32 %v4992_v34, %v1461_v27 }
 0x274   :  { %3642 = vmatpush3.msra.mxu1 %v5601_v58 }
 0x275   :  { %3643 = vmatprep.subr.mxu1 %v5554_v54  ;;  %v1463_v35 = vand.u32 4294901760, %v1462_v28  ;;  %v5638_v28 = vld [vmem:[#allocation61_spill] sm:$0xff] }
 0x276   :  { %3644 = vmatpush3.msra.mxu1 %v5603_v17 }
 0x277   :  { %3645 = vmatprep.subr.mxu1 %v5554_v54  ;;  %3565 = vmatmul.mubr.f32.vlgmr.msra.gmra.mxu0 %v1463_v35  ;;  %v5639_v35 = vld [vmem:[#allocation64_spill] sm:$0xff] }
 0x278   :  { %3603 = vmatpush3.msra.mxu0 %v5625_v8  ;;  %3646 = vmatpush3.msra.mxu1 %v5605_v6  ;;  %v5658_v8 = vld [vmem:[#allocation71_spill] sm:$0xff] }
 0x279   :  { %3604 = vmatprep.subr.mxu0 %v5554_v54  ;;  %3647 = vmatprep.subr.mxu1 %v5554_v54 }
 0x27a   :  { %3605 = vmatpush3.msra.mxu0 %v5626_v62  ;;  %3648 = vmatpush3.msra.mxu1 %v5607_v5  ;;  %v5659_v62 = vld [vmem:[#allocation86_spill] sm:$0xff] }
 0x27b   :  { %3606 = vmatprep.subr.mxu0 %v5554_v54  ;;  %3649 = vmatprep.subr.mxu1 %v5554_v54 }
 0x27c   :  { %3607 = vmatpush3.msra.mxu0 %v5627_v9  ;;  %3650 = vmatpush3.msra.mxu1 %v5609_v38  ;;  %v5660_v9 = vld [vmem:[#allocation87_spill] sm:$0xff] }
 0x27d   :  { %3608 = vmatprep.subr.mxu0 %v5554_v54  ;;  %3651 = vmatprep.subr.mxu1 %v5554_v54 }
 0x27e   :  { %3609 = vmatpush3.msra.mxu0 %v5628_v1  ;;  %3652 = vmatpush3.msra.mxu1 %v5611_v18  ;;  %v5661_v1 = vld [vmem:[#allocation88_spill] sm:$0xff] }
 0x27f   :  { %3610 = vmatprep.subr.mxu0 %v5554_v54  ;;  %3653 = vmatprep.subr.mxu1 %v5554_v54 }
 0x280   :  { %3611 = vmatpush3.msra.mxu0 %v5629_v3  ;;  %3654 = vmatpush3.msra.mxu1 %v5613_v56  ;;  %v5662_v3 = vld [vmem:[#allocation90_spill] sm:$0xff] }
 0x281   :  { %3612 = vmatprep.subr.mxu0 %v5554_v54  ;;  %3655 = vmatprep.subr.mxu1 %v5554_v54 }
 0x282   :  { %3613 = vmatpush3.msra.mxu0 %v5630_v57  ;;  %3656 = vmatpush3.msra.mxu1 %v5615_v16  ;;  %v5664_v57 = vld [vmem:[#allocation92_spill] sm:$0xff] }
 0x283   :  { %3614 = vmatprep.subr.mxu0 %v5554_v54  ;;  %3657 = vmatprep.subr.mxu1 %v5554_v54 }
 0x284   :  { %3615 = vmatpush3.msra.mxu0 %v5631_v42  ;;  %3658 = vmatpush3.msra.mxu1 %v5617_v12  ;;  %v5665_v42 = vld [vmem:[#allocation93_spill] sm:$0xff] }
 0x285   :  { %3616 = vmatprep.subr.mxu0 %v5554_v54  ;;  %3659 = vmatprep.subr.mxu1 %v5554_v54 }
 0x286   :  { %3617 = vmatpush3.msra.mxu0 %v5632_v61  ;;  %3660 = vmatpush3.msra.mxu1 %v5619_v59  ;;  %v5666_v61 = vld [vmem:[#allocation96_spill] sm:$0xff] }
 0x287   :  { %3618 = vmatprep.subr.mxu0 %v5554_v54  ;;  %3661 = vmatprep.subr.mxu1 %v5554_v54 }
 0x288   :  { %3619 = vmatpush3.msra.mxu0 %v5633_v36  ;;  %3662 = vmatpush3.msra.mxu1 %v5621_v4  ;;  %v5667_v36 = vld [vmem:[#allocation99_spill] sm:$0xff] }
 0x289   :  { %3620 = vmatprep.subr.mxu0 %v5554_v54  ;;  %3663 = vmatprep.subr.mxu1 %v5554_v54 }
 0x28a   :  { %3621 = vmatpush3.msra.mxu0 %v5634_v45  ;;  %3664 = vmatpush3.msra.mxu1 %v5622_v60  ;;  %v5668_v45 = vld [vmem:[#allocation102_spill] sm:$0xff] }
 0x28b   :  { %3622 = vmatprep.subr.mxu0 %v5554_v54  ;;  %3665 = vmatprep.subr.mxu1 %v5554_v54 }
 0x28c   :  { %3623 = vmatpush3.msra.mxu0 %v5635_v10  ;;  %3666 = vmatpush3.msra.mxu1 %v5623_v44  ;;  %v5669_v10 = vld [vmem:[#allocation105_spill] sm:$0xff] }
 0x28d   :  { %3624 = vmatprep.subr.mxu0 %v5554_v54  ;;  %3667 = vmatprep.subr.mxu1 %v5554_v54 }
 0x28e   :  { %3625 = vmatpush3.msra.mxu0 %v5636_v37  ;;  %3668 = vmatpush3.msra.mxu1 %v5624_v25  ;;  %v5670_v37 = vld [vmem:[#allocation109_spill] sm:$0xff] }
 0x28f   :  { %3626 = vmatprep.subr.mxu0 %v5554_v54  ;;  %3670 = vmatmul.mubr.f32.vlgmr.msra.gmra.mxu1 %v1461_v27  ;;  %v5657_v27 = vld [vmem:[#allocation84_spill] sm:$0xff] }
 0x290   :  { %3707 = vmatprep.subr.mxu1 %v5554_v54  ;;  %3627 = vmatpush3.msra.mxu0 %v5637_v11  ;;  %v5671_v11 = vld [vmem:[#allocation110_spill] sm:$0xff] }
 0x291   :  { %3708 = vmatpush3.msra.mxu1 %v5597_v33  ;;  %3628 = vmatprep.subr.mxu0 %v5554_v54  ;;  %v5640_v33 = vld [vmem:[#allocation67_spill] sm:$0xff] }
 0x292   :  { %3709 = vmatprep.subr.mxu1 %v5554_v54  ;;  %3629 = vmatpush3.msra.mxu0 %v5638_v28  ;;  %v5672_v28 = vld [vmem:[#allocation111_spill] sm:$0xff] }
 0x293   :  { %3710 = vmatpush3.msra.mxu1 %v5599_v32  ;;  %3630 = vmatprep.subr.mxu0 %v5554_v54  ;;  %v5641_v32 = vld [vmem:[#allocation24_spill] sm:$0xff] }
 0x294   :  { %3711 = vmatprep.subr.mxu1 %v5554_v54  ;;  %3631 = vmatpush3.msra.mxu0 %v5639_v35 }
 0x295   :  { %3712 = vmatpush3.msra.mxu1 %v5601_v58  ;;  %3632 = vmatprep.subr.mxu0 %v5554_v54  ;;  %v5642_v58 = vld [vmem:[#allocation25_spill] sm:$0xff] }
 0x296   :  { %3713 = vmatprep.subr.mxu1 %v5554_v54  ;;  %3633 = vmatpush3.msra.mxu0 %v5640_v33 }
 0x297   :  { %3634 = vmatprep.mubr.msk.f32.mxu0 %vm4055_vm0, %v5554_v54  ;;  %3714 = vmatpush3.msra.mxu1 %v5603_v17  ;;  %v5643_v17 = vld [vmem:[#allocation26_spill] sm:$0xff] }
 0x298   :  { %3635 = vmatmul.mubr.f32.vlgmr.msra.gmra.mxu0 %v4992_v34  ;;  %3672 = vmatprep.subr.mxu0 %v5554_v54  ;;  %v5655_v34 = vld [vmem:[#allocation78_spill] sm:$0xff] }
 0x299   :  { %3715 = vmatprep.subr.mxu1 %v5554_v54  ;;  %3673 = vmatpush3.msra.mxu0 %v5641_v32 }
 0x29a   :  { %3716 = vmatpush3.msra.mxu1 %v5605_v6  ;;  %3674 = vmatprep.subr.mxu0 %v5554_v54  ;;  %v5644_v6 = vld [vmem:[#allocation28_spill] sm:$0xff] }
 0x29b   :  { %3717 = vmatprep.subr.mxu1 %v5554_v54  ;;  %3675 = vmatpush3.msra.mxu0 %v5642_v58 }
 0x29c   :  { %3718 = vmatpush3.msra.mxu1 %v5607_v5  ;;  %3676 = vmatprep.subr.mxu0 %v5554_v54  ;;  %v5645_v5 = vld [vmem:[#allocation30_spill] sm:$0xff] }
 0x29d   :  { %3719 = vmatprep.subr.mxu1 %v5554_v54  ;;  %3677 = vmatpush3.msra.mxu0 %v5643_v17 }
 0x29e   :  { %3720 = vmatpush3.msra.mxu1 %v5609_v38  ;;  %3678 = vmatprep.subr.mxu0 %v5554_v54  ;;  %v5646_v38 = vld [vmem:[#allocation36_spill] sm:$0xff] }
 0x29f   :  { %3721 = vmatprep.subr.mxu1 %v5554_v54  ;;  %3679 = vmatpush3.msra.mxu0 %v5644_v6 }
 0x2a0   :  { %3722 = vmatpush3.msra.mxu1 %v5611_v18  ;;  %3680 = vmatprep.subr.mxu0 %v5554_v54  ;;  %v5647_v18 = vld [vmem:[#allocation40_spill] sm:$0xff] }
 0x2a1   :  { %3723 = vmatprep.subr.mxu1 %v5554_v54  ;;  %3681 = vmatpush3.msra.mxu0 %v5645_v5 }
 0x2a2   :  { %3724 = vmatpush3.msra.mxu1 %v5613_v56  ;;  %3682 = vmatprep.subr.mxu0 %v5554_v54  ;;  %v5648_v56 = vld [vmem:[#allocation44_spill] sm:$0xff] }
 0x2a3   :  { %3725 = vmatprep.subr.mxu1 %v5554_v54  ;;  %3683 = vmatpush3.msra.mxu0 %v5646_v38 }
 0x2a4   :  { %3726 = vmatpush3.msra.mxu1 %v5615_v16  ;;  %3684 = vmatprep.subr.mxu0 %v5554_v54  ;;  %v5649_v16 = vld [vmem:[#allocation47_spill] sm:$0xff] }
 0x2a5   :  { %3727 = vmatprep.subr.mxu1 %v5554_v54  ;;  %3685 = vmatpush3.msra.mxu0 %v5647_v18 }
 0x2a6   :  { %3728 = vmatpush3.msra.mxu1 %v5617_v12  ;;  %3686 = vmatprep.subr.mxu0 %v5554_v54  ;;  %v5650_v12 = vld [vmem:[#allocation52_spill] sm:$0xff] }
 0x2a7   :  { %3729 = vmatprep.subr.mxu1 %v5554_v54  ;;  %3687 = vmatpush3.msra.mxu0 %v5648_v56 }
 0x2a8   :  { %3730 = vmatpush3.msra.mxu1 %v5619_v59  ;;  %3688 = vmatprep.subr.mxu0 %v5554_v54  ;;  %v5651_v59 = vld [vmem:[#allocation56_spill] sm:$0xff] }
 0x2a9   :  { %3731 = vmatprep.subr.mxu1 %v5554_v54  ;;  %3689 = vmatpush3.msra.mxu0 %v5649_v16 }
 0x2aa   :  { %3732 = vmatpush3.msra.mxu1 %v5621_v4  ;;  %3690 = vmatprep.subr.mxu0 %v5554_v54  ;;  %v5652_v4 = vld [vmem:[#allocation60_spill] sm:$0xff] }
 0x2ab   :  { %3733 = vmatprep.subr.mxu1 %v5554_v54  ;;  %3691 = vmatpush3.msra.mxu0 %v5650_v12 }
 0x2ac   :  { %3734 = vmatpush3.msra.mxu1 %v5622_v60  ;;  %3692 = vmatprep.subr.mxu0 %v5554_v54  ;;  %v5653_v60 = vld [vmem:[#allocation63_spill] sm:$0xff] }
 0x2ad   :  { %3735 = vmatprep.subr.mxu1 %v5554_v54  ;;  %3693 = vmatpush3.msra.mxu0 %v5651_v59  ;;  %v2020_v59 = vlaneseq }
 0x2ae   :  { %3736 = vmatpush3.msra.mxu1 %v5623_v44  ;;  %3694 = vmatprep.subr.mxu0 %v5554_v54  ;;  %v5654_v44 = vld [vmem:[#allocation66_spill] sm:$0xff] }
 0x2af   :  { %3737 = vmatprep.subr.mxu1 %v5554_v54  ;;  %3695 = vmatpush3.msra.mxu0 %v5652_v4 }
 0x2b0   :  { %3738 = vmatpush3.msra.mxu1 %v5624_v25  ;;  %3739 = vmatprep.mubr.msk.f32.mxu1 %vm4055_vm0, %v5554_v54  ;;  %v5656_v25 = vld [vmem:[#allocation69_spill] sm:$0xff] }
 0x2b1   :  { %3696 = vmatprep.subr.mxu0 %v5554_v54  ;;  %3740 = vmatmul.mubr.f32.vlgmr.msra.gmra.mxu1 %v4988_v48 }
 0x2b2   :  { %3697 = vmatpush3.msra.mxu0 %v5653_v60  ;;  %3704 = vmatprep.mubr.msk.f32.mxu0 %vm4055_vm0, %v5554_v54 }
 0x2b3   :  { %3698 = vmatprep.subr.mxu0 %v5554_v54  ;;  %3777 = vmatprep.subr.mxu1 %v5554_v54 }
 0x2b4   :  { %3699 = vmatpush3.msra.mxu0 %v5654_v44  ;;  %3778 = vmatpush3.msra.mxu1 %v5655_v34  ;;  %v2021_v44 = vand.u32 127, %v2020_v59 }
 0x2b5   :  { %3700 = vmatprep.subr.mxu0 %v5554_v54  ;;  %3779 = vmatprep.subr.mxu1 %v5554_v54 }
 0x2b6   :  { %3701 = vmatpush3.msra.mxu0 %v5656_v25  ;;  %3780 = vmatpush3.msra.mxu1 %v5657_v27  ;;  %vm2022_vm1 = vcmp.lt.s32.totalorder %v2021_v44, 4 }
 0x2b7   :  { %3702 = vmatprep.subr.mxu0 %v5554_v54  ;;  %3781 = vmatprep.subr.mxu1 %v5554_v54 }
 0x2b8   :  { %3703 = vmatpush3.msra.mxu0 %v5658_v8  ;;  %3782 = vmatpush3.msra.mxu1 %v5659_v62 }
 0x2b9   :  { %3705 = vmatmul.mubr.f32.vlgmr.msra.gmra.mxu0 %v4988_v48  ;;  %3783 = vmatprep.subr.mxu1 %v5554_v54  ;;  %v5663_v48 = vld [vmem:[#allocation91_spill] sm:$0xff] }
 0x2ba   :  { %3784 = vmatpush3.msra.mxu1 %v5660_v9  ;;  %3742 = vmatprep.subr.mxu0 %v5554_v54 }
 0x2bb   :  { %3785 = vmatprep.subr.mxu1 %v5554_v54  ;;  %3743 = vmatpush3.msra.mxu0 %v4513_v26 }
 0x2bc   :  { %3786 = vmatpush3.msra.mxu1 %v5661_v1  ;;  %3744 = vmatprep.subr.mxu0 %v5554_v54 }
 0x2bd   :  { %3787 = vmatprep.subr.mxu1 %v5554_v54  ;;  %3745 = vmatpush3.msra.mxu0 %v4518_v51 }
 0x2be   :  { %3788 = vmatpush3.msra.mxu1 %v5662_v3  ;;  %3746 = vmatprep.subr.mxu0 %v5554_v54 }
 0x2bf   :  { %3789 = vmatprep.subr.mxu1 %v5554_v54  ;;  %3747 = vmatpush3.msra.mxu0 %v4528_v39 }
 0x2c0   :  { %3790 = vmatpush3.msra.mxu1 %v5663_v48  ;;  %3748 = vmatprep.subr.mxu0 %v5554_v54 }
 0x2c1   :  { %3791 = vmatprep.subr.mxu1 %v5554_v54  ;;  %3749 = vmatpush3.msra.mxu0 %v4530_v19 }
 0x2c2   :  { %3792 = vmatpush3.msra.mxu1 %v5664_v57  ;;  %3750 = vmatprep.subr.mxu0 %v5554_v54 }
 0x2c3   :  { %3793 = vmatprep.subr.mxu1 %v5554_v54  ;;  %3751 = vmatpush3.msra.mxu0 %v4533_v53 }
 0x2c4   :  { %3794 = vmatpush3.msra.mxu1 %v5665_v42  ;;  %3752 = vmatprep.subr.mxu0 %v5554_v54 }
 0x2c5   :  { %3795 = vmatprep.subr.mxu1 %v5554_v54  ;;  %3753 = vmatpush3.msra.mxu0 %v4535_v46 }
 0x2c6   :  { %3796 = vmatpush3.msra.mxu1 %v5666_v61  ;;  %3754 = vmatprep.subr.mxu0 %v5554_v54 }
 0x2c7   :  { %3797 = vmatprep.subr.mxu1 %v5554_v54  ;;  %3755 = vmatpush3.msra.mxu0 %v4538_v40 }
 0x2c8   :  { %3798 = vmatpush3.msra.mxu1 %v5667_v36  ;;  %3756 = vmatprep.subr.mxu0 %v5554_v54 }
 0x2c9   :  { %3799 = vmatprep.subr.mxu1 %v5554_v54  ;;  %3757 = vmatpush3.msra.mxu0 %v4540_v29 }
 0x2ca   :  { %3800 = vmatpush3.msra.mxu1 %v5668_v45  ;;  %3758 = vmatprep.subr.mxu0 %v5554_v54 }
 0x2cb   :  { %3801 = vmatprep.subr.mxu1 %v5554_v54  ;;  %3759 = vmatpush3.msra.mxu0 %v4596_v47 }
 0x2cc   :  { %3802 = vmatpush3.msra.mxu1 %v5669_v10  ;;  %3760 = vmatprep.subr.mxu0 %v5554_v54 }
 0x2cd   :  { %3803 = vmatprep.subr.mxu1 %v5554_v54  ;;  %3761 = vmatpush3.msra.mxu0 %v4641_v31 }
 0x2ce   :  { %3804 = vmatpush3.msra.mxu1 %v5670_v37  ;;  %3762 = vmatprep.subr.mxu0 %v5554_v54 }
 0x2cf   :  { %3805 = vmatprep.subr.mxu1 %v5554_v54  ;;  %3763 = vmatpush3.msra.mxu0 %v4652_v55 }
 0x2d0   :  { %3806 = vmatpush3.msra.mxu1 %v5671_v11  ;;  %3764 = vmatprep.subr.mxu0 %v5554_v54 }
 0x2d1   :  { %3807 = vmatprep.subr.mxu1 %v5554_v54  ;;  %3765 = vmatpush3.msra.mxu0 %v4666_v7 }
 0x2d2   :  { %3808 = vmatpush3.msra.mxu1 %v5672_v28  ;;  %3766 = vmatprep.subr.mxu0 %v5554_v54 }
 0x2d3   :  { %3809 = vmatprep.mubr.msk.f32.mxu1 %vm4055_vm0, %v5554_v54  ;;  %3847 = vmatprep.subr.mxu1 %v5554_v54 }
 0x2d4   :  { %3767 = vmatpush3.msra.mxu0 %v4680_v63  ;;  %3774 = vmatprep.mubr.msk.f32.mxu0 %vm4055_vm0, %v5554_v54 }
 0x2d5   :  { %3768 = vmatprep.subr.mxu0 %v5554_v54 }
 0x2d6   :  { %3769 = vmatpush3.msra.mxu0 %v4698_v14 }
 0x2d7   :  { %3770 = vmatprep.subr.mxu0 %v5554_v54 }
 0x2d8   :  { %3771 = vmatpush3.msra.mxu0 %v4709_v13 }
 0x2d9   :  { %3772 = vmatprep.subr.mxu0 %v5554_v54 }
 0x2da   :  { %3773 = vmatpush3.msra.mxu0 %v4725_v49 }
 0x2db   :  { %3812 = vmatprep.subr.mxu0 %v5554_v54 }
 0x32f   :  { %v1616_v35 = vpop.f32.mrf.mxu1 }
 0x331   :  { %v3601_v33 = vpop.f32.mrf.mxu1 }
 0x337   :  { %v1465_v32 = vpop.f32.mrf.mxu0 }
 0x338   :  { %v1617_v56 = vadd.f32 %v1616_v35, %v1465_v32 }
 0x339   :  { %v3566_v58 = vpop.f32.mrf.mxu0 }
 0x33a   :  { %v2702_v58 = vld [vmem:[%s5359_s1] ss:$0 sm:$0xff] }
 0x34f   :  { %v1809_v17 = vpop.f32.mrf.mxu1 }
 0x351   :  { %v3671_v6 = vpop.f32.mrf.mxu1 }
 0x352   :  { %v2703_v6 = vld [vmem:[%s5360_s2] ss:$0 sm:$0xff] }
 0x358   :  { %v1720_v5 = vpop.f32.mrf.mxu0 }
 0x359   :  { %v1721_v12 = vadd.f32 %v1720_v5, %v1617_v56 }
 0x35a   :  { %v3636_v38 = vpop.f32.mrf.mxu0 }
 0x35b   :  { %v1810_v4 = vadd.f32 %v1809_v17, %v1721_v12 }
 0x371   :  { %v2015_v18 = vpop.f32.mrf.mxu1 }
 0x373   :  { %v3741_v16 = vpop.f32.mrf.mxu1 }
 0x379   :  { %v1928_v60 = vpop.f32.mrf.mxu0 }
 0x37a   :  { %v1929_v34 = vadd.f32 %v1928_v60, %v1810_v4 }
 0x37b   :  { %v3706_v25 = vpop.f32.mrf.mxu0 }
 0x37c   :  { %v2016_v27 = vadd.f32 %v2015_v18, %v1929_v34 }
 0x37e   :  { %v2019_v8 = vmul.f32 0.03125, %v2016_v27 }
 0x380   :  { %v2023_v62 = vsel %vm2022_vm1, %v2019_v8, 1.0 }
 0x381   :  { %v2024_v9 = vadd.f32 1e-12, %v2023_v62 }
 0x383   :  { %3960 = vrcp.f32 %v2024_v9 }
 0x390   :  { %v3961_v1 = vpop.eup %3960 }
 0x391   :  { %v2026_v3 = vmul.f32 %v3961_v1, %v3961_v1 }
 0x393   :  { %v5203_v48 = vand.u32 4294901760, %v2026_v3 }
 0x395   :  { %3810 = vmatmul.mubr.f32.vlgmr.msra.gmra.mxu1 %v5203_v48  ;;  %v5207_v57 = vsub.f32 %v2026_v3, %v5203_v48 }
 0x396   :  { %3848 = vmatpush3.msra.mxu1 %v4513_v26  ;;  %3879 = vmatprep.mubr.msk.f32.mxu1 %vm4055_vm0, %v5554_v54 }
 0x397   :  { %3849 = vmatprep.subr.mxu1 %v5554_v54  ;;  %v2110_v42 = vand.u32 4294901760, %v5207_v57 }
 0x398   :  { %3850 = vmatpush3.msra.mxu1 %v4518_v51 }
 0x399   :  { %3851 = vmatprep.subr.mxu1 %v5554_v54  ;;  %v2111_v61 = vsub.f32 %v5207_v57, %v2110_v42 }
 0x39a   :  { %3852 = vmatpush3.msra.mxu1 %v4528_v39 }
 0x39b   :  { %3853 = vmatprep.subr.mxu1 %v5554_v54  ;;  %v2112_v36 = vand.u32 4294901760, %v2111_v61 }
 0x39c   :  { %3854 = vmatpush3.msra.mxu1 %v4530_v19 }
 0x39d   :  { %3855 = vmatprep.subr.mxu1 %v5554_v54  ;;  %3775 = vmatmul.mubr.f32.vlgmr.msra.gmra.mxu0 %v2112_v36 }
 0x39e   :  { %3813 = vmatpush3.msra.mxu0 %v4516_v2  ;;  %3856 = vmatpush3.msra.mxu1 %v4533_v53 }
 0x39f   :  { %3814 = vmatprep.subr.mxu0 %v5554_v54  ;;  %3857 = vmatprep.subr.mxu1 %v5554_v54 }
 0x3a0   :  { %3815 = vmatpush3.msra.mxu0 %v4526_v52  ;;  %3858 = vmatpush3.msra.mxu1 %v4535_v46  ;;  %v5690_v52 = vld [vmem:[#allocation104_spill] sm:$0xff] }
 0x3a1   :  { %3816 = vmatprep.subr.mxu0 %v5554_v54  ;;  %3859 = vmatprep.subr.mxu1 %v5554_v54 }
 0x3a2   :  { %3817 = vmatpush3.msra.mxu0 %v4548_v24  ;;  %3860 = vmatpush3.msra.mxu1 %v4538_v40  ;;  %v5678_v24 = vld [vmem:[#allocation77_spill] sm:$0xff] }
 0x3a3   :  { %3818 = vmatprep.subr.mxu0 %v5554_v54  ;;  %3861 = vmatprep.subr.mxu1 %v5554_v54 }
 0x3a4   :  { %3819 = vmatpush3.msra.mxu0 %v4551_v23  ;;  %3862 = vmatpush3.msra.mxu1 %v4540_v29  ;;  %v5677_v23 = vld [vmem:[#allocation76_spill] sm:$0xff] }
 0x3a5   :  { %3820 = vmatprep.subr.mxu0 %v5554_v54  ;;  %3863 = vmatprep.subr.mxu1 %v5554_v54 }
 0x3a6   :  { %3821 = vmatpush3.msra.mxu0 %v4555_v0  ;;  %3864 = vmatpush3.msra.mxu1 %v4596_v47  ;;  %v5673_v0 = vld [vmem:[#allocation98_spill] sm:$0xff] }
 0x3a7   :  { %3822 = vmatprep.subr.mxu0 %v5554_v54  ;;  %3865 = vmatprep.subr.mxu1 %v5554_v54 }
 0x3a8   :  { %3823 = vmatpush3.msra.mxu0 %v4558_v22  ;;  %3866 = vmatpush3.msra.mxu1 %v4641_v31  ;;  %v5676_v22 = vld [vmem:[#allocation107_spill] sm:$0xff] }
 0x3a9   :  { %3824 = vmatprep.subr.mxu0 %v5554_v54  ;;  %3867 = vmatprep.subr.mxu1 %v5554_v54 }
 0x3aa   :  { %3825 = vmatpush3.msra.mxu0 %v4561_v50  ;;  %3868 = vmatpush3.msra.mxu1 %v4652_v55  ;;  %v5689_v50 = vld [vmem:[#allocation100_spill] sm:$0xff] }
 0x3ab   :  { %3826 = vmatprep.subr.mxu0 %v5554_v54  ;;  %3869 = vmatprep.subr.mxu1 %v5554_v54 }
 0x3ac   :  { %3827 = vmatpush3.msra.mxu0 %v4565_v41  ;;  %3870 = vmatpush3.msra.mxu1 %v4666_v7  ;;  %v5687_v41 = vld [vmem:[#allocation95_spill] sm:$0xff] }
 0x3ad   :  { %3828 = vmatprep.subr.mxu0 %v5554_v54  ;;  %3871 = vmatprep.subr.mxu1 %v5554_v54 }
 0x3ae   :  { %3829 = vmatpush3.msra.mxu0 %v4612_v21  ;;  %3872 = vmatpush3.msra.mxu1 %v4680_v63  ;;  %v5675_v21 = vld [vmem:[#allocation103_spill] sm:$0xff] }
 0x3af   :  { %3830 = vmatprep.subr.mxu0 %v5554_v54  ;;  %3873 = vmatprep.subr.mxu1 %v5554_v54 }
 0x3b0   :  { %3831 = vmatpush3.msra.mxu0 %v4650_v20  ;;  %3874 = vmatpush3.msra.mxu1 %v4698_v14  ;;  %v5674_v20 = vld [vmem:[#allocation101_spill] sm:$0xff] }
 0x3b1   :  { %3832 = vmatprep.subr.mxu0 %v5554_v54  ;;  %3875 = vmatprep.subr.mxu1 %v5554_v54 }
 0x3b2   :  { %3833 = vmatpush3.msra.mxu0 %v4664_v43  ;;  %3876 = vmatpush3.msra.mxu1 %v4709_v13 }
 0x3b3   :  { %3834 = vmatprep.subr.mxu0 %v5554_v54  ;;  %3877 = vmatprep.subr.mxu1 %v5554_v54 }
 0x3b4   :  { %3835 = vmatpush3.msra.mxu0 %v4678_v30  ;;  %3878 = vmatpush3.msra.mxu1 %v4725_v49 }
 0x3b5   :  { %3836 = vmatprep.subr.mxu0 %v5554_v54  ;;  %3880 = vmatmul.mubr.f32.vlgmr.msra.gmra.mxu1 %v2110_v42 }
 0x3b6   :  { %3917 = vmatprep.subr.mxu1 %v5554_v54  ;;  %3837 = vmatpush3.msra.mxu0 %v5673_v0 }
 0x3b7   :  { %3918 = vmatpush3.msra.mxu1 %v4513_v26  ;;  %3838 = vmatprep.subr.mxu0 %v5554_v54 }
 0x3b8   :  { %3919 = vmatprep.subr.mxu1 %v5554_v54  ;;  %3839 = vmatpush3.msra.mxu0 %v5674_v20 }
 0x3b9   :  { %3920 = vmatpush3.msra.mxu1 %v4518_v51  ;;  %3840 = vmatprep.subr.mxu0 %v5554_v54 }
 0x3ba   :  { %3921 = vmatprep.subr.mxu1 %v5554_v54  ;;  %3841 = vmatpush3.msra.mxu0 %v5675_v21 }
 0x3bb   :  { %3922 = vmatpush3.msra.mxu1 %v4528_v39  ;;  %3842 = vmatprep.subr.mxu0 %v5554_v54  ;;  %v5686_v39 = vld [vmem:[#allocation94_spill] sm:$0xff] }
 0x3bc   :  { %3923 = vmatprep.subr.mxu1 %v5554_v54  ;;  %3843 = vmatpush3.msra.mxu0 %v5676_v22 }
 0x3bd   :  { %3844 = vmatprep.mubr.msk.f32.mxu0 %vm4055_vm0, %v5554_v54  ;;  %3924 = vmatpush3.msra.mxu1 %v4530_v19  ;;  %v5679_v19 = vld [vmem:[#allocation79_spill] sm:$0xff] }
 0x3be   :  { %3845 = vmatmul.mubr.f32.vlgmr.msra.gmra.mxu0 %v5207_v57  ;;  %3882 = vmatprep.subr.mxu0 %v5554_v54 }
 0x3bf   :  { %3925 = vmatprep.subr.mxu1 %v5554_v54  ;;  %3883 = vmatpush3.msra.mxu0 %v5677_v23 }
 0x3c0   :  { %3926 = vmatpush3.msra.mxu1 %v4533_v53  ;;  %3884 = vmatprep.subr.mxu0 %v5554_v54  ;;  %v5680_v53 = vld [vmem:[#allocation80_spill] sm:$0xff] }
 0x3c1   :  { %3927 = vmatprep.subr.mxu1 %v5554_v54  ;;  %3885 = vmatpush3.msra.mxu0 %v5678_v24 }
 0x3c2   :  { %3928 = vmatpush3.msra.mxu1 %v4535_v46  ;;  %3886 = vmatprep.subr.mxu0 %v5554_v54  ;;  %v5681_v46 = vld [vmem:[#allocation81_spill] sm:$0xff] }
 0x3c3   :  { %3929 = vmatprep.subr.mxu1 %v5554_v54  ;;  %3887 = vmatpush3.msra.mxu0 %v5679_v19 }
 0x3c4   :  { %3930 = vmatpush3.msra.mxu1 %v4538_v40  ;;  %3888 = vmatprep.subr.mxu0 %v5554_v54  ;;  %v5682_v40 = vld [vmem:[#allocation82_spill] sm:$0xff] }
 0x3c5   :  { %3931 = vmatprep.subr.mxu1 %v5554_v54  ;;  %3889 = vmatpush3.msra.mxu0 %v5680_v53 }
 0x3c6   :  { %3932 = vmatpush3.msra.mxu1 %v4540_v29  ;;  %3890 = vmatprep.subr.mxu0 %v5554_v54  ;;  %v5683_v29 = vld [vmem:[#allocation83_spill] sm:$0xff] }
 0x3c7   :  { %3933 = vmatprep.subr.mxu1 %v5554_v54  ;;  %3891 = vmatpush3.msra.mxu0 %v5681_v46 }
 0x3c8   :  { %3934 = vmatpush3.msra.mxu1 %v4596_v47  ;;  %3892 = vmatprep.subr.mxu0 %v5554_v54  ;;  %v5684_v47 = vld [vmem:[#allocation85_spill] sm:$0xff] }
 0x3c9   :  { %3935 = vmatprep.subr.mxu1 %v5554_v54  ;;  %3893 = vmatpush3.msra.mxu0 %v5682_v40 }
 0x3ca   :  { %3936 = vmatpush3.msra.mxu1 %v4641_v31  ;;  %3894 = vmatprep.subr.mxu0 %v5554_v54  ;;  %v5685_v31 = vld [vmem:[#allocation89_spill] sm:$0xff] }
 0x3cb   :  { %3937 = vmatprep.subr.mxu1 %v5554_v54  ;;  %3895 = vmatpush3.msra.mxu0 %v5683_v29 }
 0x3cc   :  { %3938 = vmatpush3.msra.mxu1 %v4652_v55  ;;  %3896 = vmatprep.subr.mxu0 %v5554_v54 }
 0x3cd   :  { %3939 = vmatprep.subr.mxu1 %v5554_v54  ;;  %3897 = vmatpush3.msra.mxu0 %v5684_v47 }
 0x3ce   :  { %3940 = vmatpush3.msra.mxu1 %v4666_v7  ;;  %3898 = vmatprep.subr.mxu0 %v5554_v54 }
 0x3cf   :  { %3941 = vmatprep.subr.mxu1 %v5554_v54  ;;  %3899 = vmatpush3.msra.mxu0 %v5685_v31 }
 0x3d0   :  { %3942 = vmatpush3.msra.mxu1 %v4680_v63  ;;  %3900 = vmatprep.subr.mxu0 %v5554_v54  ;;  %v5688_v63 = vld [vmem:[#allocation97_spill] sm:$0xff] }
 0x3d1   :  { %3943 = vmatprep.subr.mxu1 %v5554_v54  ;;  %3901 = vmatpush3.msra.mxu0 %v5686_v39 }
 0x3d2   :  { %3944 = vmatpush3.msra.mxu1 %v4698_v14  ;;  %3902 = vmatprep.subr.mxu0 %v5554_v54  ;;  %v5691_v14 = vld [vmem:[#allocation106_spill] sm:$0xff] }
 0x3d3   :  { %3945 = vmatprep.subr.mxu1 %v5554_v54  ;;  %3903 = vmatpush3.msra.mxu0 %v5687_v41 }
 0x3d4   :  { %3946 = vmatpush3.msra.mxu1 %v4709_v13  ;;  %3904 = vmatprep.subr.mxu0 %v5554_v54 }
 0x3d5   :  { %3947 = vmatprep.subr.mxu1 %v5554_v54  ;;  %3905 = vmatpush3.msra.mxu0 %v5688_v63 }
 0x3d6   :  { %3948 = vmatpush3.msra.mxu1 %v4725_v49  ;;  %3949 = vmatprep.mubr.msk.f32.mxu1 %vm4055_vm0, %v5554_v54  ;;  %v5692_v49 = vld [vmem:[#allocation108_spill] sm:$0xff] }
 0x3d7   :  { %3906 = vmatprep.subr.mxu0 %v5554_v54  ;;  %3950 = vmatmul.mubr.f32.vlgmr.msra.gmra.mxu1 %v5203_v48 }
 0x3d8   :  { %3907 = vmatpush3.msra.mxu0 %v5689_v50  ;;  %3914 = vmatprep.mubr.msk.f32.mxu0 %vm4055_vm0, %v5554_v54 }
 0x3d9   :  { %3908 = vmatprep.subr.mxu0 %v5554_v54 }
 0x3da   :  { %3909 = vmatpush3.msra.mxu0 %v5690_v52 }
 0x3db   :  { %3910 = vmatprep.subr.mxu0 %v5554_v54 }
 0x3dc   :  { %3911 = vmatpush3.msra.mxu0 %v5691_v14 }
 0x3dd   :  { %3912 = vmatprep.subr.mxu0 %v5554_v54 }
 0x3de   :  { %3913 = vmatpush3.msra.mxu0 %v5692_v49 }
 0x3df   :  { %3915 = vmatmul.mubr.f32.vlgmr.msra.gmra.mxu0 %v5203_v48 }
 0x455   :  { %v2265_v26 = vpop.f32.mrf.mxu1 }
 0x457   :  { %v3811_v2 = vpop.f32.mrf.mxu1 }
 0x45d   :  { %v2114_v51 = vpop.f32.mrf.mxu0 }
 0x45e   :  { %v2266_v10 = vadd.f32 %v2265_v26, %v2114_v51 }
 0x45f   :  { %v3776_v55 = vpop.f32.mrf.mxu0 }
 0x475   :  { %v2458_v43 = vpop.f32.mrf.mxu1 }
 0x477   :  { %v3881_v7 = vpop.f32.mrf.mxu1 }
 0x47e   :  { %v2369_v30 = vpop.f32.mrf.mxu0 }
 0x47f   :  { %v2370_v11 = vadd.f32 %v2369_v30, %v2266_v10 }
 0x480   :  { %v3846_v13 = vpop.f32.mrf.mxu0 }
 0x481   :  { %v2459_v28 = vadd.f32 %v2458_v43, %v2370_v11 }
 0x497   :  { %v2664_v45 = vpop.f32.mrf.mxu1 }
 0x499   :  { %v3951_v37 = vpop.f32.mrf.mxu1 }
 0x49f   :  { %v2577_v35 = vpop.f32.mrf.mxu0 }
 0x4a0   :  { %v2578_v33 = vadd.f32 %v2577_v35, %v2459_v28 }
 0x4a1   :  { %v3916_v54 = vpop.f32.mrf.mxu0 }
 0x4a2   :  { %v2665_v32 = vadd.f32 %v2664_v45, %v2578_v33 }
 0x4a4   :  { %v2668_v17 = vmul.f32 %v2665_v32, %v4984_v15 }
 0x4a6   :  { %v2676_v5 = vmul.f32 %v2702_v58, %v2668_v17 }
 0x4a8   :  { %v2684_v38 = vadd.f32 %v2703_v6, %v2676_v5 }
 0x4aa   :  { %2685 = vst [vmem:[#allocation8] sm:$0xf] %v2684_v38 }
 0x4ab   :  { %4034 = shalt.err (!%p4031_p5)
}
 0x4ac   :  { %2695 = dma.vmem_to_hbm [thread:$0]  %s2693_s12, 64, %s5363_s5, [#allocation4]  }
 0x4ad   :  { %4047 = dma.done.wait [#allocation4], 64  }
 0x4ae   :  { %4048 = vsyncadd [#allocation4], 4294967232 }
 0x4af   :  { %2699 = vsyncpa [#allocation3], 1 }
 0x4b0   :  { %2700 = vsyncpa [#allocation6], 1 }
 0x4b1   :  { %2701 = vsyncpa [#allocation4], 1 }

</bundles_post_ra>
